<compile_context>
chip_gen: v6e
topology: v6e:2x2x1
jax: 0.10.0
libtpu: 0.0.40
codegen_flags: <defaults>
</compile_context>

<pallas_src>
import functools

import jax
import jax.numpy as jnp
from jax.experimental import pallas as pl
from jax.experimental.pallas import tpu as pltpu


def _round_up(x, m):
    return ((x + m - 1) // m) * m


def _padded_buf_bytes(shape, dtype):
    """Rough single-buffer VMEM footprint of `shape`, honoring (8*packing, 128) tiling."""
    itemsize = jnp.dtype(dtype).itemsize
    packing = max(1, 4 // itemsize)
    lanes = _round_up(int(shape[-1]), 128)
    sub = _round_up(int(shape[-2]), 8 * packing) if len(shape) >= 2 else 1
    lead = 1
    for d in shape[:-2]:
        lead *= int(d)
    return lead * sub * lanes * itemsize


def _windowed_linear_kernel(y_ref, w_ref, b_ref, o_ref, *, window_len, step, tile_w):
    """One (batch, window-tile) grid step of Flatten -> Linear -> ReLU over windows.

    y_ref: (step, U, C)   phase-split activations, resident for the whole batch
    w_ref: (L, C, H)      permuted weight, w_ref[l, c, h] == weight[c*L + l, h]
    b_ref: (1, H)         f32 bias
    o_ref: (tile_w, H)    output rows for windows [j*tile_w, (j+1)*tile_w) of batch b
    """
    j = pl.program_id(1)
    u0 = j * tile_w
    h = o_ref.shape[-1]
    acc = jnp.zeros((tile_w, h), jnp.float32)
    # Window w (global index u0 + w) needs sample x[:, w*step + l]; with l = q*step + r
    # that sample lives at y[r, u0 + w + q, :], so each l contributes exactly one
    # contiguous (tile_w, C) sublane slice.
    # TODO(synk): for very large window_len switch this unrolled loop to pl.loop.
    for l in range(window_len):
        q, r = divmod(l, step)
        a = y_ref[r, pl.ds(u0 + q, tile_w), :]                       # (tile_w, C)
        acc = acc + jnp.dot(a, w_ref[l], preferred_element_type=jnp.float32)
    # Epilogue stays f32 on all generations (v5e has no bf16 VPU path).
    o_ref[...] = jnp.maximum(acc + b_ref[...], 0.0).astype(o_ref.dtype)


def windowed_apply(x, weight, bias, *, window_len, step,
                   matmul_dtype=jnp.bfloat16, out_dtype=None):
    """x: (B, C, T) -> (B, W, H) with f = Flatten -> Linear(C*window_len, H) -> ReLU.

    weight: (C*window_len, H) -- NOTE: this is the TRANSPOSE of PyTorch
    nn.Linear's (H, C*window_len) weight; rows are in Flatten(C, L) order.
    matmul_dtype: dtype of the MXU operands (default bf16 on all generations);
    accumulation, bias add and ReLU are always f32.  out_dtype defaults to x.dtype.
    """
    B, C, T = x.shape
    L = window_len
    assert T >= L, "The size of the time dimension must be at least window_len."
    assert weight.ndim == 2 and weight.shape[0] == C * L, (
        "weight must be (C*window_len, H), i.e. the transpose of PyTorch "
        "nn.Linear's (H, C*window_len) weight")
    H = weight.shape[1]
    assert bias.shape == (H,)
    Wn = (T - L) // step + 1
    out_dtype = x.dtype if out_dtype is None else out_dtype
    mdt = x.dtype if matmul_dtype is None else matmul_dtype

    # --- chip VMEM capacity (v5e/v6e: 128 MiB, v7x: 64 MiB per TensorCore) ---
    try:
        vmem_cap = int(pltpu.get_tpu_info().vmem_capacity_bytes)
    except Exception:
        vmem_cap = 64 << 20                      # conservative (v7x per-core)

    # --- window-tile size: bigger tiles on 128 MiB parts, keep >=2 tiles for megacore ---
    max_tw = 512 if vmem_cap <= (64 << 20) else 1024
    if B == 1 and Wn > 16:
        max_tw = min(max_tw, _round_up(-(-Wn // 2), 16))   # >= 2 tiles so both v7x TCs work
    if Wn <= max_tw:
        tile_w = Wn                              # block == full dim: no padding, no slice
    else:
        tile_w = max_tw                          # multiple of 16 (bf16-safe sublane packing)
    wn_pad = _round_up(Wn, tile_w)
    n_wt = wn_pad // tile_w

    # --- phase-split layout: y2[b, r, u, c] = x[b, c, u*step + r] (single pass, fused cast) ---
    lq = (L - 1) // step + 1                     # number of q phases per window
    u_pad = max(wn_pad + lq - 1, -(-T // step))  # covers all (padded) window reads + real data
    t_pad = u_pad * step
    x_p = x if t_pad == T else jnp.pad(x, ((0, 0), (0, 0), (0, t_pad - T)))
    y2 = jnp.transpose(x_p.reshape(B, C, u_pad, step), (0, 3, 2, 1)).astype(mdt)  # (B,step,U,C)

    # TODO(synk): hoist these tiny parameter transforms to module init (precompute once per model).
    w_l = jnp.transpose(weight.reshape(C, L, H), (1, 0, 2)).astype(mdt)   # (L, C, H)
    b_r = bias.reshape(1, H).astype(jnp.float32)

    # --- VMEM budget (padding-aware) and explicit limit ---
    est = (2 * _padded_buf_bytes((step, u_pad, C), mdt)       # activation slab (double-buffered)
           + 1 * _padded_buf_bytes((L, C, H), mdt)            # weight (single-buffered)
           + 2 * _padded_buf_bytes((1, H), jnp.float32)       # bias
           + 2 * _padded_buf_bytes((tile_w, H), out_dtype)    # output tile (double-buffered)
           + _padded_buf_bytes((tile_w, H), jnp.float32)      # f32 accumulator
           + 2 * _padded_buf_bytes((tile_w, C), mdt))         # window slices in flight
    if est > int(0.85 * vmem_cap):
        # TODO(synk): tile the time axis (manual per-tile slab DMA) for very long sequences.
        raise NotImplementedError(
            f"per-batch activation slab needs ~{est >> 20} MiB VMEM "
            f"(> {vmem_cap >> 20} MiB on this chip); time-axis tiling not implemented")
    vmem_limit = int(min(0.85 * vmem_cap, max(32 << 20, 2 * est)))

    kernel = functools.partial(_windowed_linear_kernel,
                               window_len=L, step=step, tile_w=tile_w)

    def _build(weight_spec):
        return pl.pallas_call(
            kernel,
            out_shape=jax.ShapeDtypeStruct((B, wn_pad, H), out_dtype),
            grid_spec=pltpu.PrefetchScalarGridSpec(
                num_scalar_prefetch=0,
                grid=(B, n_wt),
                in_specs=[
                    # Whole per-batch slab; index_map constant in j => fetched once per batch.
                    pl.BlockSpec((None, step, u_pad, C), lambda b, j: (b, 0, 0, 0)),
                    weight_spec,
                    pl.BlockSpec((1, H), lambda b, j: (0, 0)),
                ],
                # Exact-width H output (no 128-lane padding pass); reshape-free (B, W, H) layout.
                out_specs=pl.BlockSpec((None, tile_w, H), lambda b, j: (b, j, 0)),
            ),
            compiler_params=pltpu.CompilerParams(
                dimension_semantics=("parallel", "parallel"),
                vmem_limit_bytes=vmem_limit,
            ),
        )

    try:
        # Grid-invariant weight: single-buffer it (halves its VMEM; matters on v7x's 64 MiB).
        out = _build(pl.BlockSpec((L, C, H), lambda b, j: (0, 0, 0),
                                  pipeline_mode=pl.Buffered(1)))(y2, w_l, b_r)
    except Exception:
        # Fallback: default double-buffering (same semantics, only costs VMEM headroom).
        out = _build(pl.BlockSpec((L, C, H), lambda b, j: (0, 0, 0)))(y2, w_l, b_r)

    return out if wn_pad == Wn else out[:, :Wn, :]


def windowed_apply_ref(x, weight, bias, *, window_len, step):
    """Pure-JAX reference reproducing the PyTorch module semantics exactly."""
    B, C, T = x.shape
    L = window_len
    Wn = (T - L) // step + 1
    idx = jnp.arange(Wn)[:, None] * step + jnp.arange(L)[None, :]
    x_unf = x[:, :, idx]                                       # (B, C, W, L)
    x_perm = jnp.transpose(x_unf, (0, 2, 1, 3))                # (B, W, C, L)
    xw = x_perm.reshape(B * Wn, C * L)                         # f's Flatten (C, L order)
    y = jnp.maximum(xw @ weight + bias, 0.0)                   # f's Linear + ReLU
    return y.reshape(B, Wn, -1)                                # (B, W, H)


if __name__ == "__main__":
    # small shapes consistent with the module: x is (B, C, T)
    B, C, T = 2, 4, 64
    window_len, step = 16, 8
    H = 32

    key = jax.random.PRNGKey(0)
    kx, kw, kb = jax.random.split(key, 3)
    x = jax.random.normal(kx, (B, C, T), dtype=jnp.float32)
    # deterministic synthetic parameters of f = Flatten -> Linear(C*window_len -> H) -> ReLU
    # NOTE: weight is (C*L, H), i.e. the transpose of PyTorch nn.Linear's (H, C*L) weight.
    weight = 0.05 * jax.random.normal(kw, (C * window_len, H), dtype=jnp.float32)
    bias = 0.05 * jax.random.normal(kb, (H,), dtype=jnp.float32)

    ref = windowed_apply_ref(x, weight, bias, window_len=window_len, step=step)

    # f32 operand path (tight tolerance).
    out_f32 = windowed_apply(x, weight, bias, window_len=window_len, step=step,
                             matmul_dtype=None)
    out_f32 = jax.block_until_ready(out_f32)
    assert out_f32.shape == ref.shape == (B, (T - window_len) // step + 1, H)
    assert jnp.allclose(out_f32, ref, atol=1e-5, rtol=1e-5), "f32 mismatch vs reference"

    # Default path: bf16 MXU operands (all generations), f32 accumulation + epilogue.
    out_bf16 = windowed_apply(x, weight, bias, window_len=window_len, step=step)
    out_bf16 = jax.block_until_ready(out_bf16)
    assert out_bf16.shape == ref.shape
    assert jnp.allclose(out_bf16, ref, atol=2e-2, rtol=5e-2), "bf16 mismatch vs reference"

    print("KERNEL_OK")
</pallas_src>

<mosaic_0001>
module attributes {stable_mosaic.version = 11 : i64} {
  func.func @_windowed_linear_kernel(%arg0: i32, %arg1: i32, %arg2: memref<1x8x8x4xf32, #tpu.memory_space<vmem>>, %arg3: memref<16x4x32xf32, #tpu.memory_space<vmem>>, %arg4: memref<1x32xf32, #tpu.memory_space<vmem>>, %arg5: memref<1x7x32xf32, #tpu.memory_space<vmem>>) attributes {dimension_semantics = [#tpu.dimension_semantics<parallel>, #tpu.dimension_semantics<parallel>], iteration_bounds = array<i64: 2, 1>, scalar_prefetch = 0 : i64, scratch_operands = 0 : i64, tpu.core_type = #tpu.core_type<tc>, window_params = [{transform_indices = @transform_0, window_bounds = array<i64: 1, 8, 8, 4>}, {pipeline_mode = #tpu.pipeline_mode<synchronous>, transform_indices = @transform_1, window_bounds = array<i64: 16, 4, 32>}, {pipeline_mode = #tpu.pipeline_mode<synchronous>, transform_indices = @transform_2, window_bounds = array<i64: 1, 32>}, {transform_indices = @transform_3, window_bounds = array<i64: 1, 7, 32>}]} {
    %c7_i32 = arith.constant 7 : i32
    %0 = arith.muli %arg1, %c7_i32 : i32
    %cst = arith.constant 0.000000e+00 : f32
    %1 = vector.broadcast %cst : f32 to vector<7x32xf32>
    %c0_i32 = arith.constant 0 : i32
    %2 = arith.addi %0, %c0_i32 : i32
    %c0 = arith.constant 0 : index
    %c0_0 = arith.constant 0 : index
    %3 = arith.index_cast %2 : i32 to index
    %c0_1 = arith.constant 0 : index
    %4 = vector.load %arg2[%c0, %c0_0, %3, %c0_1] : memref<1x8x8x4xf32, #tpu.memory_space<vmem>>, vector<1x1x7x4xf32>
    %5 = vector.shape_cast %4 : vector<1x1x7x4xf32> to vector<7x4xf32>
    %c0_2 = arith.constant 0 : index
    %c0_3 = arith.constant 0 : index
    %c0_4 = arith.constant 0 : index
    %6 = vector.load %arg3[%c0_2, %c0_3, %c0_4] : memref<16x4x32xf32, #tpu.memory_space<vmem>>, vector<1x4x32xf32>
    %7 = vector.shape_cast %6 : vector<1x4x32xf32> to vector<4x32xf32>
    %cst_5 = arith.constant dense<0.000000e+00> : vector<7x32xf32>
    %8 = tpu.matmul %5, %7, %cst_5 {dimension_numbers = #tpu.dot_dimension_numbers<[1], [0], [0], [1], [0, 0, 1, 1], [], []>} : vector<7x4xf32>, vector<4x32xf32>, vector<7x32xf32> -> vector<7x32xf32>
    %9 = arith.addf %1, %8 : vector<7x32xf32>
    %c0_i32_6 = arith.constant 0 : i32
    %10 = arith.addi %0, %c0_i32_6 : i32
    %c0_7 = arith.constant 0 : index
    %c1 = arith.constant 1 : index
    %11 = arith.index_cast %10 : i32 to index
    %c0_8 = arith.constant 0 : index
    %12 = vector.load %arg2[%c0_7, %c1, %11, %c0_8] : memref<1x8x8x4xf32, #tpu.memory_space<vmem>>, vector<1x1x7x4xf32>
    %13 = vector.shape_cast %12 : vector<1x1x7x4xf32> to vector<7x4xf32>
    %c1_9 = arith.constant 1 : index
    %c0_10 = arith.constant 0 : index
    %c0_11 = arith.constant 0 : index
    %14 = vector.load %arg3[%c1_9, %c0_10, %c0_11] : memref<16x4x32xf32, #tpu.memory_space<vmem>>, vector<1x4x32xf32>
    %15 = vector.shape_cast %14 : vector<1x4x32xf32> to vector<4x32xf32>
    %cst_12 = arith.constant dense<0.000000e+00> : vector<7x32xf32>
    %16 = tpu.matmul %13, %15, %cst_12 {dimension_numbers = #tpu.dot_dimension_numbers<[1], [0], [0], [1], [0, 0, 1, 1], [], []>} : vector<7x4xf32>, vector<4x32xf32>, vector<7x32xf32> -> vector<7x32xf32>
    %17 = arith.addf %9, %16 : vector<7x32xf32>
    %c0_i32_13 = arith.constant 0 : i32
    %18 = arith.addi %0, %c0_i32_13 : i32
    %c0_14 = arith.constant 0 : index
    %c2 = arith.constant 2 : index
    %19 = arith.index_cast %18 : i32 to index
    %c0_15 = arith.constant 0 : index
    %20 = vector.load %arg2[%c0_14, %c2, %19, %c0_15] : memref<1x8x8x4xf32, #tpu.memory_space<vmem>>, vector<1x1x7x4xf32>
    %21 = vector.shape_cast %20 : vector<1x1x7x4xf32> to vector<7x4xf32>
    %c2_16 = arith.constant 2 : index
    %c0_17 = arith.constant 0 : index
    %c0_18 = arith.constant 0 : index
    %22 = vector.load %arg3[%c2_16, %c0_17, %c0_18] : memref<16x4x32xf32, #tpu.memory_space<vmem>>, vector<1x4x32xf32>
    %23 = vector.shape_cast %22 : vector<1x4x32xf32> to vector<4x32xf32>
    %cst_19 = arith.constant dense<0.000000e+00> : vector<7x32xf32>
    %24 = tpu.matmul %21, %23, %cst_19 {dimension_numbers = #tpu.dot_dimension_numbers<[1], [0], [0], [1], [0, 0, 1, 1], [], []>} : vector<7x4xf32>, vector<4x32xf32>, vector<7x32xf32> -> vector<7x32xf32>
    %25 = arith.addf %17, %24 : vector<7x32xf32>
    %c0_i32_20 = arith.constant 0 : i32
    %26 = arith.addi %0, %c0_i32_20 : i32
    %c0_21 = arith.constant 0 : index
    %c3 = arith.constant 3 : index
    %27 = arith.index_cast %26 : i32 to index
    %c0_22 = arith.constant 0 : index
    %28 = vector.load %arg2[%c0_21, %c3, %27, %c0_22] : memref<1x8x8x4xf32, #tpu.memory_space<vmem>>, vector<1x1x7x4xf32>
    %29 = vector.shape_cast %28 : vector<1x1x7x4xf32> to vector<7x4xf32>
    %c3_23 = arith.constant 3 : index
    %c0_24 = arith.constant 0 : index
    %c0_25 = arith.constant 0 : index
    %30 = vector.load %arg3[%c3_23, %c0_24, %c0_25] : memref<16x4x32xf32, #tpu.memory_space<vmem>>, vector<1x4x32xf32>
    %31 = vector.shape_cast %30 : vector<1x4x32xf32> to vector<4x32xf32>
    %cst_26 = arith.constant dense<0.000000e+00> : vector<7x32xf32>
    %32 = tpu.matmul %29, %31, %cst_26 {dimension_numbers = #tpu.dot_dimension_numbers<[1], [0], [0], [1], [0, 0, 1, 1], [], []>} : vector<7x4xf32>, vector<4x32xf32>, vector<7x32xf32> -> vector<7x32xf32>
    %33 = arith.addf %25, %32 : vector<7x32xf32>
    %c0_i32_27 = arith.constant 0 : i32
    %34 = arith.addi %0, %c0_i32_27 : i32
    %c0_28 = arith.constant 0 : index
    %c4 = arith.constant 4 : index
    %35 = arith.index_cast %34 : i32 to index
    %c0_29 = arith.constant 0 : index
    %36 = vector.load %arg2[%c0_28, %c4, %35, %c0_29] : memref<1x8x8x4xf32, #tpu.memory_space<vmem>>, vector<1x1x7x4xf32>
    %37 = vector.shape_cast %36 : vector<1x1x7x4xf32> to vector<7x4xf32>
    %c4_30 = arith.constant 4 : index
    %c0_31 = arith.constant 0 : index
    %c0_32 = arith.constant 0 : index
    %38 = vector.load %arg3[%c4_30, %c0_31, %c0_32] : memref<16x4x32xf32, #tpu.memory_space<vmem>>, vector<1x4x32xf32>
    %39 = vector.shape_cast %38 : vector<1x4x32xf32> to vector<4x32xf32>
    %cst_33 = arith.constant dense<0.000000e+00> : vector<7x32xf32>
    %40 = tpu.matmul %37, %39, %cst_33 {dimension_numbers = #tpu.dot_dimension_numbers<[1], [0], [0], [1], [0, 0, 1, 1], [], []>} : vector<7x4xf32>, vector<4x32xf32>, vector<7x32xf32> -> vector<7x32xf32>
    %41 = arith.addf %33, %40 : vector<7x32xf32>
    %c0_i32_34 = arith.constant 0 : i32
    %42 = arith.addi %0, %c0_i32_34 : i32
    %c0_35 = arith.constant 0 : index
    %c5 = arith.constant 5 : index
    %43 = arith.index_cast %42 : i32 to index
    %c0_36 = arith.constant 0 : index
    %44 = vector.load %arg2[%c0_35, %c5, %43, %c0_36] : memref<1x8x8x4xf32, #tpu.memory_space<vmem>>, vector<1x1x7x4xf32>
    %45 = vector.shape_cast %44 : vector<1x1x7x4xf32> to vector<7x4xf32>
    %c5_37 = arith.constant 5 : index
    %c0_38 = arith.constant 0 : index
    %c0_39 = arith.constant 0 : index
    %46 = vector.load %arg3[%c5_37, %c0_38, %c0_39] : memref<16x4x32xf32, #tpu.memory_space<vmem>>, vector<1x4x32xf32>
    %47 = vector.shape_cast %46 : vector<1x4x32xf32> to vector<4x32xf32>
    %cst_40 = arith.constant dense<0.000000e+00> : vector<7x32xf32>
    %48 = tpu.matmul %45, %47, %cst_40 {dimension_numbers = #tpu.dot_dimension_numbers<[1], [0], [0], [1], [0, 0, 1, 1], [], []>} : vector<7x4xf32>, vector<4x32xf32>, vector<7x32xf32> -> vector<7x32xf32>
    %49 = arith.addf %41, %48 : vector<7x32xf32>
    %c0_i32_41 = arith.constant 0 : i32
    %50 = arith.addi %0, %c0_i32_41 : i32
    %c0_42 = arith.constant 0 : index
    %c6 = arith.constant 6 : index
    %51 = arith.index_cast %50 : i32 to index
    %c0_43 = arith.constant 0 : index
    %52 = vector.load %arg2[%c0_42, %c6, %51, %c0_43] : memref<1x8x8x4xf32, #tpu.memory_space<vmem>>, vector<1x1x7x4xf32>
    %53 = vector.shape_cast %52 : vector<1x1x7x4xf32> to vector<7x4xf32>
    %c6_44 = arith.constant 6 : index
    %c0_45 = arith.constant 0 : index
    %c0_46 = arith.constant 0 : index
    %54 = vector.load %arg3[%c6_44, %c0_45, %c0_46] : memref<16x4x32xf32, #tpu.memory_space<vmem>>, vector<1x4x32xf32>
    %55 = vector.shape_cast %54 : vector<1x4x32xf32> to vector<4x32xf32>
    %cst_47 = arith.constant dense<0.000000e+00> : vector<7x32xf32>
    %56 = tpu.matmul %53, %55, %cst_47 {dimension_numbers = #tpu.dot_dimension_numbers<[1], [0], [0], [1], [0, 0, 1, 1], [], []>} : vector<7x4xf32>, vector<4x32xf32>, vector<7x32xf32> -> vector<7x32xf32>
    %57 = arith.addf %49, %56 : vector<7x32xf32>
    %c0_i32_48 = arith.constant 0 : i32
    %58 = arith.addi %0, %c0_i32_48 : i32
    %c0_49 = arith.constant 0 : index
    %c7 = arith.constant 7 : index
    %59 = arith.index_cast %58 : i32 to index
    %c0_50 = arith.constant 0 : index
    %60 = vector.load %arg2[%c0_49, %c7, %59, %c0_50] : memref<1x8x8x4xf32, #tpu.memory_space<vmem>>, vector<1x1x7x4xf32>
    %61 = vector.shape_cast %60 : vector<1x1x7x4xf32> to vector<7x4xf32>
    %c7_51 = arith.constant 7 : index
    %c0_52 = arith.constant 0 : index
    %c0_53 = arith.constant 0 : index
    %62 = vector.load %arg3[%c7_51, %c0_52, %c0_53] : memref<16x4x32xf32, #tpu.memory_space<vmem>>, vector<1x4x32xf32>
    %63 = vector.shape_cast %62 : vector<1x4x32xf32> to vector<4x32xf32>
    %cst_54 = arith.constant dense<0.000000e+00> : vector<7x32xf32>
    %64 = tpu.matmul %61, %63, %cst_54 {dimension_numbers = #tpu.dot_dimension_numbers<[1], [0], [0], [1], [0, 0, 1, 1], [], []>} : vector<7x4xf32>, vector<4x32xf32>, vector<7x32xf32> -> vector<7x32xf32>
    %65 = arith.addf %57, %64 : vector<7x32xf32>
    %c1_i32 = arith.constant 1 : i32
    %66 = arith.addi %0, %c1_i32 : i32
    %c0_55 = arith.constant 0 : index
    %c0_56 = arith.constant 0 : index
    %67 = arith.index_cast %66 : i32 to index
    %c0_57 = arith.constant 0 : index
    %68 = vector.load %arg2[%c0_55, %c0_56, %67, %c0_57] : memref<1x8x8x4xf32, #tpu.memory_space<vmem>>, vector<1x1x7x4xf32>
    %69 = vector.shape_cast %68 : vector<1x1x7x4xf32> to vector<7x4xf32>
    %c8 = arith.constant 8 : index
    %c0_58 = arith.constant 0 : index
    %c0_59 = arith.constant 0 : index
    %70 = vector.load %arg3[%c8, %c0_58, %c0_59] : memref<16x4x32xf32, #tpu.memory_space<vmem>>, vector<1x4x32xf32>
    %71 = vector.shape_cast %70 : vector<1x4x32xf32> to vector<4x32xf32>
    %cst_60 = arith.constant dense<0.000000e+00> : vector<7x32xf32>
    %72 = tpu.matmul %69, %71, %cst_60 {dimension_numbers = #tpu.dot_dimension_numbers<[1], [0], [0], [1], [0, 0, 1, 1], [], []>} : vector<7x4xf32>, vector<4x32xf32>, vector<7x32xf32> -> vector<7x32xf32>
    %73 = arith.addf %65, %72 : vector<7x32xf32>
    %c1_i32_61 = arith.constant 1 : i32
    %74 = arith.addi %0, %c1_i32_61 : i32
    %c0_62 = arith.constant 0 : index
    %c1_63 = arith.constant 1 : index
    %75 = arith.index_cast %74 : i32 to index
    %c0_64 = arith.constant 0 : index
    %76 = vector.load %arg2[%c0_62, %c1_63, %75, %c0_64] : memref<1x8x8x4xf32, #tpu.memory_space<vmem>>, vector<1x1x7x4xf32>
    %77 = vector.shape_cast %76 : vector<1x1x7x4xf32> to vector<7x4xf32>
    %c9 = arith.constant 9 : index
    %c0_65 = arith.constant 0 : index
    %c0_66 = arith.constant 0 : index
    %78 = vector.load %arg3[%c9, %c0_65, %c0_66] : memref<16x4x32xf32, #tpu.memory_space<vmem>>, vector<1x4x32xf32>
    %79 = vector.shape_cast %78 : vector<1x4x32xf32> to vector<4x32xf32>
    %cst_67 = arith.constant dense<0.000000e+00> : vector<7x32xf32>
    %80 = tpu.matmul %77, %79, %cst_67 {dimension_numbers = #tpu.dot_dimension_numbers<[1], [0], [0], [1], [0, 0, 1, 1], [], []>} : vector<7x4xf32>, vector<4x32xf32>, vector<7x32xf32> -> vector<7x32xf32>
    %81 = arith.addf %73, %80 : vector<7x32xf32>
    %c1_i32_68 = arith.constant 1 : i32
    %82 = arith.addi %0, %c1_i32_68 : i32
    %c0_69 = arith.constant 0 : index
    %c2_70 = arith.constant 2 : index
    %83 = arith.index_cast %82 : i32 to index
    %c0_71 = arith.constant 0 : index
    %84 = vector.load %arg2[%c0_69, %c2_70, %83, %c0_71] : memref<1x8x8x4xf32, #tpu.memory_space<vmem>>, vector<1x1x7x4xf32>
    %85 = vector.shape_cast %84 : vector<1x1x7x4xf32> to vector<7x4xf32>
    %c10 = arith.constant 10 : index
    %c0_72 = arith.constant 0 : index
    %c0_73 = arith.constant 0 : index
    %86 = vector.load %arg3[%c10, %c0_72, %c0_73] : memref<16x4x32xf32, #tpu.memory_space<vmem>>, vector<1x4x32xf32>
    %87 = vector.shape_cast %86 : vector<1x4x32xf32> to vector<4x32xf32>
    %cst_74 = arith.constant dense<0.000000e+00> : vector<7x32xf32>
    %88 = tpu.matmul %85, %87, %cst_74 {dimension_numbers = #tpu.dot_dimension_numbers<[1], [0], [0], [1], [0, 0, 1, 1], [], []>} : vector<7x4xf32>, vector<4x32xf32>, vector<7x32xf32> -> vector<7x32xf32>
    %89 = arith.addf %81, %88 : vector<7x32xf32>
    %c1_i32_75 = arith.constant 1 : i32
    %90 = arith.addi %0, %c1_i32_75 : i32
    %c0_76 = arith.constant 0 : index
    %c3_77 = arith.constant 3 : index
    %91 = arith.index_cast %90 : i32 to index
    %c0_78 = arith.constant 0 : index
    %92 = vector.load %arg2[%c0_76, %c3_77, %91, %c0_78] : memref<1x8x8x4xf32, #tpu.memory_space<vmem>>, vector<1x1x7x4xf32>
    %93 = vector.shape_cast %92 : vector<1x1x7x4xf32> to vector<7x4xf32>
    %c11 = arith.constant 11 : index
    %c0_79 = arith.constant 0 : index
    %c0_80 = arith.constant 0 : index
    %94 = vector.load %arg3[%c11, %c0_79, %c0_80] : memref<16x4x32xf32, #tpu.memory_space<vmem>>, vector<1x4x32xf32>
    %95 = vector.shape_cast %94 : vector<1x4x32xf32> to vector<4x32xf32>
    %cst_81 = arith.constant dense<0.000000e+00> : vector<7x32xf32>
    %96 = tpu.matmul %93, %95, %cst_81 {dimension_numbers = #tpu.dot_dimension_numbers<[1], [0], [0], [1], [0, 0, 1, 1], [], []>} : vector<7x4xf32>, vector<4x32xf32>, vector<7x32xf32> -> vector<7x32xf32>
    %97 = arith.addf %89, %96 : vector<7x32xf32>
    %c1_i32_82 = arith.constant 1 : i32
    %98 = arith.addi %0, %c1_i32_82 : i32
    %c0_83 = arith.constant 0 : index
    %c4_84 = arith.constant 4 : index
    %99 = arith.index_cast %98 : i32 to index
    %c0_85 = arith.constant 0 : index
    %100 = vector.load %arg2[%c0_83, %c4_84, %99, %c0_85] : memref<1x8x8x4xf32, #tpu.memory_space<vmem>>, vector<1x1x7x4xf32>
    %101 = vector.shape_cast %100 : vector<1x1x7x4xf32> to vector<7x4xf32>
    %c12 = arith.constant 12 : index
    %c0_86 = arith.constant 0 : index
    %c0_87 = arith.constant 0 : index
    %102 = vector.load %arg3[%c12, %c0_86, %c0_87] : memref<16x4x32xf32, #tpu.memory_space<vmem>>, vector<1x4x32xf32>
    %103 = vector.shape_cast %102 : vector<1x4x32xf32> to vector<4x32xf32>
    %cst_88 = arith.constant dense<0.000000e+00> : vector<7x32xf32>
    %104 = tpu.matmul %101, %103, %cst_88 {dimension_numbers = #tpu.dot_dimension_numbers<[1], [0], [0], [1], [0, 0, 1, 1], [], []>} : vector<7x4xf32>, vector<4x32xf32>, vector<7x32xf32> -> vector<7x32xf32>
    %105 = arith.addf %97, %104 : vector<7x32xf32>
    %c1_i32_89 = arith.constant 1 : i32
    %106 = arith.addi %0, %c1_i32_89 : i32
    %c0_90 = arith.constant 0 : index
    %c5_91 = arith.constant 5 : index
    %107 = arith.index_cast %106 : i32 to index
    %c0_92 = arith.constant 0 : index
    %108 = vector.load %arg2[%c0_90, %c5_91, %107, %c0_92] : memref<1x8x8x4xf32, #tpu.memory_space<vmem>>, vector<1x1x7x4xf32>
    %109 = vector.shape_cast %108 : vector<1x1x7x4xf32> to vector<7x4xf32>
    %c13 = arith.constant 13 : index
    %c0_93 = arith.constant 0 : index
    %c0_94 = arith.constant 0 : index
    %110 = vector.load %arg3[%c13, %c0_93, %c0_94] : memref<16x4x32xf32, #tpu.memory_space<vmem>>, vector<1x4x32xf32>
    %111 = vector.shape_cast %110 : vector<1x4x32xf32> to vector<4x32xf32>
    %cst_95 = arith.constant dense<0.000000e+00> : vector<7x32xf32>
    %112 = tpu.matmul %109, %111, %cst_95 {dimension_numbers = #tpu.dot_dimension_numbers<[1], [0], [0], [1], [0, 0, 1, 1], [], []>} : vector<7x4xf32>, vector<4x32xf32>, vector<7x32xf32> -> vector<7x32xf32>
    %113 = arith.addf %105, %112 : vector<7x32xf32>
    %c1_i32_96 = arith.constant 1 : i32
    %114 = arith.addi %0, %c1_i32_96 : i32
    %c0_97 = arith.constant 0 : index
    %c6_98 = arith.constant 6 : index
    %115 = arith.index_cast %114 : i32 to index
    %c0_99 = arith.constant 0 : index
    %116 = vector.load %arg2[%c0_97, %c6_98, %115, %c0_99] : memref<1x8x8x4xf32, #tpu.memory_space<vmem>>, vector<1x1x7x4xf32>
    %117 = vector.shape_cast %116 : vector<1x1x7x4xf32> to vector<7x4xf32>
    %c14 = arith.constant 14 : index
    %c0_100 = arith.constant 0 : index
    %c0_101 = arith.constant 0 : index
    %118 = vector.load %arg3[%c14, %c0_100, %c0_101] : memref<16x4x32xf32, #tpu.memory_space<vmem>>, vector<1x4x32xf32>
    %119 = vector.shape_cast %118 : vector<1x4x32xf32> to vector<4x32xf32>
    %cst_102 = arith.constant dense<0.000000e+00> : vector<7x32xf32>
    %120 = tpu.matmul %117, %119, %cst_102 {dimension_numbers = #tpu.dot_dimension_numbers<[1], [0], [0], [1], [0, 0, 1, 1], [], []>} : vector<7x4xf32>, vector<4x32xf32>, vector<7x32xf32> -> vector<7x32xf32>
    %121 = arith.addf %113, %120 : vector<7x32xf32>
    %c1_i32_103 = arith.constant 1 : i32
    %122 = arith.addi %0, %c1_i32_103 : i32
    %c0_104 = arith.constant 0 : index
    %c7_105 = arith.constant 7 : index
    %123 = arith.index_cast %122 : i32 to index
    %c0_106 = arith.constant 0 : index
    %124 = vector.load %arg2[%c0_104, %c7_105, %123, %c0_106] : memref<1x8x8x4xf32, #tpu.memory_space<vmem>>, vector<1x1x7x4xf32>
    %125 = vector.shape_cast %124 : vector<1x1x7x4xf32> to vector<7x4xf32>
    %c15 = arith.constant 15 : index
    %c0_107 = arith.constant 0 : index
    %c0_108 = arith.constant 0 : index
    %126 = vector.load %arg3[%c15, %c0_107, %c0_108] : memref<16x4x32xf32, #tpu.memory_space<vmem>>, vector<1x4x32xf32>
    %127 = vector.shape_cast %126 : vector<1x4x32xf32> to vector<4x32xf32>
    %cst_109 = arith.constant dense<0.000000e+00> : vector<7x32xf32>
    %128 = tpu.matmul %125, %127, %cst_109 {dimension_numbers = #tpu.dot_dimension_numbers<[1], [0], [0], [1], [0, 0, 1, 1], [], []>} : vector<7x4xf32>, vector<4x32xf32>, vector<7x32xf32> -> vector<7x32xf32>
    %129 = arith.addf %121, %128 : vector<7x32xf32>
    %c0_110 = arith.constant 0 : index
    %c0_111 = arith.constant 0 : index
    %130 = vector.load %arg4[%c0_110, %c0_111] : memref<1x32xf32, #tpu.memory_space<vmem>>, vector<1x32xf32>
    %131 = vector.broadcast %130 : vector<1x32xf32> to vector<7x32xf32>
    %132 = arith.addf %129, %131 : vector<7x32xf32>
    %cst_112 = arith.constant 0.000000e+00 : f32
    %133 = vector.broadcast %cst_112 : f32 to vector<7x32xf32>
    %134 = arith.maximumf %132, %133 : vector<7x32xf32>
    %c0_113 = arith.constant 0 : index
    %c0_114 = arith.constant 0 : index
    %c0_115 = arith.constant 0 : index
    %135 = vector.load %arg5[%c0_113, %c0_114, %c0_115] : memref<1x7x32xf32, #tpu.memory_space<vmem>>, vector<1x7x32xf32>
    %136 = vector.shape_cast %135 : vector<1x7x32xf32> to vector<7x32xf32>
    %137 = vector.shape_cast %134 : vector<7x32xf32> to vector<1x7x32xf32>
    tpu.vector_store %arg5[%c0_113, %c0_114, %c0_115], %137 {strides = array<i32>} : memref<1x7x32xf32, #tpu.memory_space<vmem>>, vector<1x7x32xf32>,
    return
  }
  func.func @transform_0(%arg0: i32, %arg1: i32) -> (i32, i32, i32, i32) {
    %c0_i32 = arith.constant 0 : i32
    %c0_i32_0 = arith.constant 0 : i32
    %c0_i32_1 = arith.constant 0 : i32
    %c0_i32_2 = arith.constant 0 : i32
    return %arg0, %c0_i32, %c0_i32_0, %c0_i32_1 : i32, i32, i32, i32
  }
  func.func @transform_1(%arg0: i32, %arg1: i32) -> (i32, i32, i32) {
    %c0_i32 = arith.constant 0 : i32
    %c0_i32_0 = arith.constant 0 : i32
    %c0_i32_1 = arith.constant 0 : i32
    %c0_i32_2 = arith.constant 0 : i32
    return %c0_i32, %c0_i32_0, %c0_i32_1 : i32, i32, i32
  }
  func.func @transform_2(%arg0: i32, %arg1: i32) -> (i32, i32) {
    %c0_i32 = arith.constant 0 : i32
    %c0_i32_0 = arith.constant 0 : i32
    %c0_i32_1 = arith.constant 0 : i32
    return %c0_i32, %c0_i32_0 : i32, i32
  }
  func.func @transform_3(%arg0: i32, %arg1: i32) -> (i32, i32, i32) {
    %c0_i32 = arith.constant 0 : i32
    %c0_i32_0 = arith.constant 0 : i32
    return %arg0, %arg1, %c0_i32 : i32, i32, i32
  }
}

module attributes {stable_mosaic.version = 11 : i64} {
  func.func @_windowed_linear_kernel(%arg0: i32, %arg1: i32, %arg2: memref<1x8x8x4xf32, #tpu.memory_space<vmem>>, %arg3: memref<16x4x32xf32, #tpu.memory_space<vmem>>, %arg4: memref<1x32xf32, #tpu.memory_space<vmem>>, %arg5: memref<1x7x32xf32, #tpu.memory_space<vmem>>) attributes {dimension_semantics = [#tpu.dimension_semantics<parallel>, #tpu.dimension_semantics<parallel>], iteration_bounds = array<i64: 2, 1>, scalar_prefetch = 0 : i64, scratch_operands = 0 : i64, tpu.core_type = #tpu.core_type<tc>, window_params = [{transform_indices = @transform_0, window_bounds = array<i64: 1, 8, 8, 4>}, {pipeline_mode = #tpu.pipeline_mode<synchronous>, transform_indices = @transform_1, window_bounds = array<i64: 16, 4, 32>}, {pipeline_mode = #tpu.pipeline_mode<synchronous>, transform_indices = @transform_2, window_bounds = array<i64: 1, 32>}, {transform_indices = @transform_3, window_bounds = array<i64: 1, 7, 32>}]} {
    %c7_i32 = arith.constant 7 : i32
    %0 = arith.muli %arg1, %c7_i32 : i32
    %cst = arith.constant 0.000000e+00 : f32
    %1 = vector.broadcast %cst : f32 to vector<7x32xf32>
    %c0_i32 = arith.constant 0 : i32
    %2 = arith.addi %0, %c0_i32 : i32
    %c0 = arith.constant 0 : index
    %c0_0 = arith.constant 0 : index
    %3 = arith.index_cast %2 : i32 to index
    %c0_1 = arith.constant 0 : index
    %4 = vector.load %arg2[%c0, %c0_0, %3, %c0_1] : memref<1x8x8x4xf32, #tpu.memory_space<vmem>>, vector<1x1x7x4xf32>
    %5 = vector.shape_cast %4 : vector<1x1x7x4xf32> to vector<7x4xf32>
    %c0_2 = arith.constant 0 : index
    %c0_3 = arith.constant 0 : index
    %c0_4 = arith.constant 0 : index
    %6 = vector.load %arg3[%c0_2, %c0_3, %c0_4] : memref<16x4x32xf32, #tpu.memory_space<vmem>>, vector<1x4x32xf32>
    %7 = vector.shape_cast %6 : vector<1x4x32xf32> to vector<4x32xf32>
    %cst_5 = arith.constant dense<0.000000e+00> : vector<7x32xf32>
    %8 = tpu.matmul %5, %7, %cst_5 {dimension_numbers = #tpu.dot_dimension_numbers<[1], [0], [0], [1], [0, 0, 1, 1], [], []>} : vector<7x4xf32>, vector<4x32xf32>, vector<7x32xf32> -> vector<7x32xf32>
    %9 = arith.addf %1, %8 : vector<7x32xf32>
    %c0_i32_6 = arith.constant 0 : i32
    %10 = arith.addi %0, %c0_i32_6 : i32
    %c0_7 = arith.constant 0 : index
    %c1 = arith.constant 1 : index
    %11 = arith.index_cast %10 : i32 to index
    %c0_8 = arith.constant 0 : index
    %12 = vector.load %arg2[%c0_7, %c1, %11, %c0_8] : memref<1x8x8x4xf32, #tpu.memory_space<vmem>>, vector<1x1x7x4xf32>
    %13 = vector.shape_cast %12 : vector<1x1x7x4xf32> to vector<7x4xf32>
    %c1_9 = arith.constant 1 : index
    %c0_10 = arith.constant 0 : index
    %c0_11 = arith.constant 0 : index
    %14 = vector.load %arg3[%c1_9, %c0_10, %c0_11] : memref<16x4x32xf32, #tpu.memory_space<vmem>>, vector<1x4x32xf32>
    %15 = vector.shape_cast %14 : vector<1x4x32xf32> to vector<4x32xf32>
    %cst_12 = arith.constant dense<0.000000e+00> : vector<7x32xf32>
    %16 = tpu.matmul %13, %15, %cst_12 {dimension_numbers = #tpu.dot_dimension_numbers<[1], [0], [0], [1], [0, 0, 1, 1], [], []>} : vector<7x4xf32>, vector<4x32xf32>, vector<7x32xf32> -> vector<7x32xf32>
    %17 = arith.addf %9, %16 : vector<7x32xf32>
    %c0_i32_13 = arith.constant 0 : i32
    %18 = arith.addi %0, %c0_i32_13 : i32
    %c0_14 = arith.constant 0 : index
    %c2 = arith.constant 2 : index
    %19 = arith.index_cast %18 : i32 to index
    %c0_15 = arith.constant 0 : index
    %20 = vector.load %arg2[%c0_14, %c2, %19, %c0_15] : memref<1x8x8x4xf32, #tpu.memory_space<vmem>>, vector<1x1x7x4xf32>
    %21 = vector.shape_cast %20 : vector<1x1x7x4xf32> to vector<7x4xf32>
    %c2_16 = arith.constant 2 : index
    %c0_17 = arith.constant 0 : index
    %c0_18 = arith.constant 0 : index
    %22 = vector.load %arg3[%c2_16, %c0_17, %c0_18] : memref<16x4x32xf32, #tpu.memory_space<vmem>>, vector<1x4x32xf32>
    %23 = vector.shape_cast %22 : vector<1x4x32xf32> to vector<4x32xf32>
    %cst_19 = arith.constant dense<0.000000e+00> : vector<7x32xf32>
    %24 = tpu.matmul %21, %23, %cst_19 {dimension_numbers = #tpu.dot_dimension_numbers<[1], [0], [0], [1], [0, 0, 1, 1], [], []>} : vector<7x4xf32>, vector<4x32xf32>, vector<7x32xf32> -> vector<7x32xf32>
    %25 = arith.addf %17, %24 : vector<7x32xf32>
    %c0_i32_20 = arith.constant 0 : i32
    %26 = arith.addi %0, %c0_i32_20 : i32
    %c0_21 = arith.constant 0 : index
    %c3 = arith.constant 3 : index
    %27 = arith.index_cast %26 : i32 to index
    %c0_22 = arith.constant 0 : index
    %28 = vector.load %arg2[%c0_21, %c3, %27, %c0_22] : memref<1x8x8x4xf32, #tpu.memory_space<vmem>>, vector<1x1x7x4xf32>
    %29 = vector.shape_cast %28 : vector<1x1x7x4xf32> to vector<7x4xf32>
    %c3_23 = arith.constant 3 : index
    %c0_24 = arith.constant 0 : index
    %c0_25 = arith.constant 0 : index
    %30 = vector.load %arg3[%c3_23, %c0_24, %c0_25] : memref<16x4x32xf32, #tpu.memory_space<vmem>>, vector<1x4x32xf32>
    %31 = vector.shape_cast %30 : vector<1x4x32xf32> to vector<4x32xf32>
    %cst_26 = arith.constant dense<0.000000e+00> : vector<7x32xf32>
    %32 = tpu.matmul %29, %31, %cst_26 {dimension_numbers = #tpu.dot_dimension_numbers<[1], [0], [0], [1], [0, 0, 1, 1], [], []>} : vector<7x4xf32>, vector<4x32xf32>, vector<7x32xf32> -> vector<7x32xf32>
    %33 = arith.addf %25, %32 : vector<7x32xf32>
    %c0_i32_27 = arith.constant 0 : i32
    %34 = arith.addi %0, %c0_i32_27 : i32
    %c0_28 = arith.constant 0 : index
    %c4 = arith.constant 4 : index
    %35 = arith.index_cast %34 : i32 to index
    %c0_29 = arith.constant 0 : index
    %36 = vector.load %arg2[%c0_28, %c4, %35, %c0_29] : memref<1x8x8x4xf32, #tpu.memory_space<vmem>>, vector<1x1x7x4xf32>
    %37 = vector.shape_cast %36 : vector<1x1x7x4xf32> to vector<7x4xf32>
    %c4_30 = arith.constant 4 : index
    %c0_31 = arith.constant 0 : index
    %c0_32 = arith.constant 0 : index
    %38 = vector.load %arg3[%c4_30, %c0_31, %c0_32] : memref<16x4x32xf32, #tpu.memory_space<vmem>>, vector<1x4x32xf32>
    %39 = vector.shape_cast %38 : vector<1x4x32xf32> to vector<4x32xf32>
    %cst_33 = arith.constant dense<0.000000e+00> : vector<7x32xf32>
    %40 = tpu.matmul %37, %39, %cst_33 {dimension_numbers = #tpu.dot_dimension_numbers<[1], [0], [0], [1], [0, 0, 1, 1], [], []>} : vector<7x4xf32>, vector<4x32xf32>, vector<7x32xf32> -> vector<7x32xf32>
    %41 = arith.addf %33, %40 : vector<7x32xf32>
    %c0_i32_34 = arith.constant 0 : i32
    %42 = arith.addi %0, %c0_i32_34 : i32
    %c0_35 = arith.constant 0 : index
    %c5 = arith.constant 5 : index
    %43 = arith.index_cast %42 : i32 to index
    %c0_36 = arith.constant 0 : index
    %44 = vector.load %arg2[%c0_35, %c5, %43, %c0_36] : memref<1x8x8x4xf32, #tpu.memory_space<vmem>>, vector<1x1x7x4xf32>
    %45 = vector.shape_cast %44 : vector<1x1x7x4xf32> to vector<7x4xf32>
    %c5_37 = arith.constant 5 : index
    %c0_38 = arith.constant 0 : index
    %c0_39 = arith.constant 0 : index
    %46 = vector.load %arg3[%c5_37, %c0_38, %c0_39] : memref<16x4x32xf32, #tpu.memory_space<vmem>>, vector<1x4x32xf32>
    %47 = vector.shape_cast %46 : vector<1x4x32xf32> to vector<4x32xf32>
    %cst_40 = arith.constant dense<0.000000e+00> : vector<7x32xf32>
    %48 = tpu.matmul %45, %47, %cst_40 {dimension_numbers = #tpu.dot_dimension_numbers<[1], [0], [0], [1], [0, 0, 1, 1], [], []>} : vector<7x4xf32>, vector<4x32xf32>, vector<7x32xf32> -> vector<7x32xf32>
    %49 = arith.addf %41, %48 : vector<7x32xf32>
    %c0_i32_41 = arith.constant 0 : i32
    %50 = arith.addi %0, %c0_i32_41 : i32
    %c0_42 = arith.constant 0 : index
    %c6 = arith.constant 6 : index
    %51 = arith.index_cast %50 : i32 to index
    %c0_43 = arith.constant 0 : index
    %52 = vector.load %arg2[%c0_42, %c6, %51, %c0_43] : memref<1x8x8x4xf32, #tpu.memory_space<vmem>>, vector<1x1x7x4xf32>
    %53 = vector.shape_cast %52 : vector<1x1x7x4xf32> to vector<7x4xf32>
    %c6_44 = arith.constant 6 : index
    %c0_45 = arith.constant 0 : index
    %c0_46 = arith.constant 0 : index
    %54 = vector.load %arg3[%c6_44, %c0_45, %c0_46] : memref<16x4x32xf32, #tpu.memory_space<vmem>>, vector<1x4x32xf32>
    %55 = vector.shape_cast %54 : vector<1x4x32xf32> to vector<4x32xf32>
    %cst_47 = arith.constant dense<0.000000e+00> : vector<7x32xf32>
    %56 = tpu.matmul %53, %55, %cst_47 {dimension_numbers = #tpu.dot_dimension_numbers<[1], [0], [0], [1], [0, 0, 1, 1], [], []>} : vector<7x4xf32>, vector<4x32xf32>, vector<7x32xf32> -> vector<7x32xf32>
    %57 = arith.addf %49, %56 : vector<7x32xf32>
    %c0_i32_48 = arith.constant 0 : i32
    %58 = arith.addi %0, %c0_i32_48 : i32
    %c0_49 = arith.constant 0 : index
    %c7 = arith.constant 7 : index
    %59 = arith.index_cast %58 : i32 to index
    %c0_50 = arith.constant 0 : index
    %60 = vector.load %arg2[%c0_49, %c7, %59, %c0_50] : memref<1x8x8x4xf32, #tpu.memory_space<vmem>>, vector<1x1x7x4xf32>
    %61 = vector.shape_cast %60 : vector<1x1x7x4xf32> to vector<7x4xf32>
    %c7_51 = arith.constant 7 : index
    %c0_52 = arith.constant 0 : index
    %c0_53 = arith.constant 0 : index
    %62 = vector.load %arg3[%c7_51, %c0_52, %c0_53] : memref<16x4x32xf32, #tpu.memory_space<vmem>>, vector<1x4x32xf32>
    %63 = vector.shape_cast %62 : vector<1x4x32xf32> to vector<4x32xf32>
    %cst_54 = arith.constant dense<0.000000e+00> : vector<7x32xf32>
    %64 = tpu.matmul %61, %63, %cst_54 {dimension_numbers = #tpu.dot_dimension_numbers<[1], [0], [0], [1], [0, 0, 1, 1], [], []>} : vector<7x4xf32>, vector<4x32xf32>, vector<7x32xf32> -> vector<7x32xf32>
    %65 = arith.addf %57, %64 : vector<7x32xf32>
    %c1_i32 = arith.constant 1 : i32
    %66 = arith.addi %0, %c1_i32 : i32
    %c0_55 = arith.constant 0 : index
    %c0_56 = arith.constant 0 : index
    %67 = arith.index_cast %66 : i32 to index
    %c0_57 = arith.constant 0 : index
    %68 = vector.load %arg2[%c0_55, %c0_56, %67, %c0_57] : memref<1x8x8x4xf32, #tpu.memory_space<vmem>>, vector<1x1x7x4xf32>
    %69 = vector.shape_cast %68 : vector<1x1x7x4xf32> to vector<7x4xf32>
    %c8 = arith.constant 8 : index
    %c0_58 = arith.constant 0 : index
    %c0_59 = arith.constant 0 : index
    %70 = vector.load %arg3[%c8, %c0_58, %c0_59] : memref<16x4x32xf32, #tpu.memory_space<vmem>>, vector<1x4x32xf32>
    %71 = vector.shape_cast %70 : vector<1x4x32xf32> to vector<4x32xf32>
    %cst_60 = arith.constant dense<0.000000e+00> : vector<7x32xf32>
    %72 = tpu.matmul %69, %71, %cst_60 {dimension_numbers = #tpu.dot_dimension_numbers<[1], [0], [0], [1], [0, 0, 1, 1], [], []>} : vector<7x4xf32>, vector<4x32xf32>, vector<7x32xf32> -> vector<7x32xf32>
    %73 = arith.addf %65, %72 : vector<7x32xf32>
    %c1_i32_61 = arith.constant 1 : i32
    %74 = arith.addi %0, %c1_i32_61 : i32
    %c0_62 = arith.constant 0 : index
    %c1_63 = arith.constant 1 : index
    %75 = arith.index_cast %74 : i32 to index
    %c0_64 = arith.constant 0 : index
    %76 = vector.load %arg2[%c0_62, %c1_63, %75, %c0_64] : memref<1x8x8x4xf32, #tpu.memory_space<vmem>>, vector<1x1x7x4xf32>
    %77 = vector.shape_cast %76 : vector<1x1x7x4xf32> to vector<7x4xf32>
    %c9 = arith.constant 9 : index
    %c0_65 = arith.constant 0 : index
    %c0_66 = arith.constant 0 : index
    %78 = vector.load %arg3[%c9, %c0_65, %c0_66] : memref<16x4x32xf32, #tpu.memory_space<vmem>>, vector<1x4x32xf32>
    %79 = vector.shape_cast %78 : vector<1x4x32xf32> to vector<4x32xf32>
    %cst_67 = arith.constant dense<0.000000e+00> : vector<7x32xf32>
    %80 = tpu.matmul %77, %79, %cst_67 {dimension_numbers = #tpu.dot_dimension_numbers<[1], [0], [0], [1], [0, 0, 1, 1], [], []>} : vector<7x4xf32>, vector<4x32xf32>, vector<7x32xf32> -> vector<7x32xf32>
    %81 = arith.addf %73, %80 : vector<7x32xf32>
    %c1_i32_68 = arith.constant 1 : i32
    %82 = arith.addi %0, %c1_i32_68 : i32
    %c0_69 = arith.constant 0 : index
    %c2_70 = arith.constant 2 : index
    %83 = arith.index_cast %82 : i32 to index
    %c0_71 = arith.constant 0 : index
    %84 = vector.load %arg2[%c0_69, %c2_70, %83, %c0_71] : memref<1x8x8x4xf32, #tpu.memory_space<vmem>>, vector<1x1x7x4xf32>
    %85 = vector.shape_cast %84 : vector<1x1x7x4xf32> to vector<7x4xf32>
    %c10 = arith.constant 10 : index
    %c0_72 = arith.constant 0 : index
    %c0_73 = arith.constant 0 : index
    %86 = vector.load %arg3[%c10, %c0_72, %c0_73] : memref<16x4x32xf32, #tpu.memory_space<vmem>>, vector<1x4x32xf32>
    %87 = vector.shape_cast %86 : vector<1x4x32xf32> to vector<4x32xf32>
    %cst_74 = arith.constant dense<0.000000e+00> : vector<7x32xf32>
    %88 = tpu.matmul %85, %87, %cst_74 {dimension_numbers = #tpu.dot_dimension_numbers<[1], [0], [0], [1], [0, 0, 1, 1], [], []>} : vector<7x4xf32>, vector<4x32xf32>, vector<7x32xf32> -> vector<7x32xf32>
    %89 = arith.addf %81, %88 : vector<7x32xf32>
    %c1_i32_75 = arith.constant 1 : i32
    %90 = arith.addi %0, %c1_i32_75 : i32
    %c0_76 = arith.constant 0 : index
    %c3_77 = arith.constant 3 : index
    %91 = arith.index_cast %90 : i32 to index
    %c0_78 = arith.constant 0 : index
    %92 = vector.load %arg2[%c0_76, %c3_77, %91, %c0_78] : memref<1x8x8x4xf32, #tpu.memory_space<vmem>>, vector<1x1x7x4xf32>
    %93 = vector.shape_cast %92 : vector<1x1x7x4xf32> to vector<7x4xf32>
    %c11 = arith.constant 11 : index
    %c0_79 = arith.constant 0 : index
    %c0_80 = arith.constant 0 : index
    %94 = vector.load %arg3[%c11, %c0_79, %c0_80] : memref<16x4x32xf32, #tpu.memory_space<vmem>>, vector<1x4x32xf32>
    %95 = vector.shape_cast %94 : vector<1x4x32xf32> to vector<4x32xf32>
    %cst_81 = arith.constant dense<0.000000e+00> : vector<7x32xf32>
    %96 = tpu.matmul %93, %95, %cst_81 {dimension_numbers = #tpu.dot_dimension_numbers<[1], [0], [0], [1], [0, 0, 1, 1], [], []>} : vector<7x4xf32>, vector<4x32xf32>, vector<7x32xf32> -> vector<7x32xf32>
    %97 = arith.addf %89, %96 : vector<7x32xf32>
    %c1_i32_82 = arith.constant 1 : i32
    %98 = arith.addi %0, %c1_i32_82 : i32
    %c0_83 = arith.constant 0 : index
    %c4_84 = arith.constant 4 : index
    %99 = arith.index_cast %98 : i32 to index
    %c0_85 = arith.constant 0 : index
    %100 = vector.load %arg2[%c0_83, %c4_84, %99, %c0_85] : memref<1x8x8x4xf32, #tpu.memory_space<vmem>>, vector<1x1x7x4xf32>
    %101 = vector.shape_cast %100 : vector<1x1x7x4xf32> to vector<7x4xf32>
    %c12 = arith.constant 12 : index
    %c0_86 = arith.constant 0 : index
    %c0_87 = arith.constant 0 : index
    %102 = vector.load %arg3[%c12, %c0_86, %c0_87] : memref<16x4x32xf32, #tpu.memory_space<vmem>>, vector<1x4x32xf32>
    %103 = vector.shape_cast %102 : vector<1x4x32xf32> to vector<4x32xf32>
    %cst_88 = arith.constant dense<0.000000e+00> : vector<7x32xf32>
    %104 = tpu.matmul %101, %103, %cst_88 {dimension_numbers = #tpu.dot_dimension_numbers<[1], [0], [0], [1], [0, 0, 1, 1], [], []>} : vector<7x4xf32>, vector<4x32xf32>, vector<7x32xf32> -> vector<7x32xf32>
    %105 = arith.addf %97, %104 : vector<7x32xf32>
    %c1_i32_89 = arith.constant 1 : i32
    %106 = arith.addi %0, %c1_i32_89 : i32
    %c0_90 = arith.constant 0 : index
    %c5_91 = arith.constant 5 : index
    %107 = arith.index_cast %106 : i32 to index
    %c0_92 = arith.constant 0 : index
    %108 = vector.load %arg2[%c0_90, %c5_91, %107, %c0_92] : memref<1x8x8x4xf32, #tpu.memory_space<vmem>>, vector<1x1x7x4xf32>
    %109 = vector.shape_cast %108 : vector<1x1x7x4xf32> to vector<7x4xf32>
    %c13 = arith.constant 13 : index
    %c0_93 = arith.constant 0 : index
    %c0_94 = arith.constant 0 : index
    %110 = vector.load %arg3[%c13, %c0_93, %c0_94] : memref<16x4x32xf32, #tpu.memory_space<vmem>>, vector<1x4x32xf32>
    %111 = vector.shape_cast %110 : vector<1x4x32xf32> to vector<4x32xf32>
    %cst_95 = arith.constant dense<0.000000e+00> : vector<7x32xf32>
    %112 = tpu.matmul %109, %111, %cst_95 {dimension_numbers = #tpu.dot_dimension_numbers<[1], [0], [0], [1], [0, 0, 1, 1], [], []>} : vector<7x4xf32>, vector<4x32xf32>, vector<7x32xf32> -> vector<7x32xf32>
    %113 = arith.addf %105, %112 : vector<7x32xf32>
    %c1_i32_96 = arith.constant 1 : i32
    %114 = arith.addi %0, %c1_i32_96 : i32
    %c0_97 = arith.constant 0 : index
    %c6_98 = arith.constant 6 : index
    %115 = arith.index_cast %114 : i32 to index
    %c0_99 = arith.constant 0 : index
    %116 = vector.load %arg2[%c0_97, %c6_98, %115, %c0_99] : memref<1x8x8x4xf32, #tpu.memory_space<vmem>>, vector<1x1x7x4xf32>
    %117 = vector.shape_cast %116 : vector<1x1x7x4xf32> to vector<7x4xf32>
    %c14 = arith.constant 14 : index
    %c0_100 = arith.constant 0 : index
    %c0_101 = arith.constant 0 : index
    %118 = vector.load %arg3[%c14, %c0_100, %c0_101] : memref<16x4x32xf32, #tpu.memory_space<vmem>>, vector<1x4x32xf32>
    %119 = vector.shape_cast %118 : vector<1x4x32xf32> to vector<4x32xf32>
    %cst_102 = arith.constant dense<0.000000e+00> : vector<7x32xf32>
    %120 = tpu.matmul %117, %119, %cst_102 {dimension_numbers = #tpu.dot_dimension_numbers<[1], [0], [0], [1], [0, 0, 1, 1], [], []>} : vector<7x4xf32>, vector<4x32xf32>, vector<7x32xf32> -> vector<7x32xf32>
    %121 = arith.addf %113, %120 : vector<7x32xf32>
    %c1_i32_103 = arith.constant 1 : i32
    %122 = arith.addi %0, %c1_i32_103 : i32
    %c0_104 = arith.constant 0 : index
    %c7_105 = arith.constant 7 : index
    %123 = arith.index_cast %122 : i32 to index
    %c0_106 = arith.constant 0 : index
    %124 = vector.load %arg2[%c0_104, %c7_105, %123, %c0_106] : memref<1x8x8x4xf32, #tpu.memory_space<vmem>>, vector<1x1x7x4xf32>
    %125 = vector.shape_cast %124 : vector<1x1x7x4xf32> to vector<7x4xf32>
    %c15 = arith.constant 15 : index
    %c0_107 = arith.constant 0 : index
    %c0_108 = arith.constant 0 : index
    %126 = vector.load %arg3[%c15, %c0_107, %c0_108] : memref<16x4x32xf32, #tpu.memory_space<vmem>>, vector<1x4x32xf32>
    %127 = vector.shape_cast %126 : vector<1x4x32xf32> to vector<4x32xf32>
    %cst_109 = arith.constant dense<0.000000e+00> : vector<7x32xf32>
    %128 = tpu.matmul %125, %127, %cst_109 {dimension_numbers = #tpu.dot_dimension_numbers<[1], [0], [0], [1], [0, 0, 1, 1], [], []>} : vector<7x4xf32>, vector<4x32xf32>, vector<7x32xf32> -> vector<7x32xf32>
    %129 = arith.addf %121, %128 : vector<7x32xf32>
    %c0_110 = arith.constant 0 : index
    %c0_111 = arith.constant 0 : index
    %130 = vector.load %arg4[%c0_110, %c0_111] : memref<1x32xf32, #tpu.memory_space<vmem>>, vector<1x32xf32>
    %131 = vector.broadcast %130 : vector<1x32xf32> to vector<7x32xf32>
    %132 = arith.addf %129, %131 : vector<7x32xf32>
    %cst_112 = arith.constant 0.000000e+00 : f32
    %133 = vector.broadcast %cst_112 : f32 to vector<7x32xf32>
    %134 = arith.maximumf %132, %133 : vector<7x32xf32>
    %c0_113 = arith.constant 0 : index
    %c0_114 = arith.constant 0 : index
    %c0_115 = arith.constant 0 : index
    %135 = vector.load %arg5[%c0_113, %c0_114, %c0_115] : memref<1x7x32xf32, #tpu.memory_space<vmem>>, vector<1x7x32xf32>
    %136 = vector.shape_cast %135 : vector<1x7x32xf32> to vector<7x32xf32>
    %137 = vector.shape_cast %134 : vector<7x32xf32> to vector<1x7x32xf32>
    tpu.vector_store %arg5[%c0_113, %c0_114, %c0_115], %137 {strides = array<i32>} : memref<1x7x32xf32, #tpu.memory_space<vmem>>, vector<1x7x32xf32>,
    return
  }
  func.func @transform_0(%arg0: i32, %arg1: i32) -> (i32, i32, i32, i32) {
    %c0_i32 = arith.constant 0 : i32
    %c0_i32_0 = arith.constant 0 : i32
    %c0_i32_1 = arith.constant 0 : i32
    %c0_i32_2 = arith.constant 0 : i32
    return %arg0, %c0_i32, %c0_i32_0, %c0_i32_1 : i32, i32, i32, i32
  }
  func.func @transform_1(%arg0: i32, %arg1: i32) -> (i32, i32, i32) {
    %c0_i32 = arith.constant 0 : i32
    %c0_i32_0 = arith.constant 0 : i32
    %c0_i32_1 = arith.constant 0 : i32
    %c0_i32_2 = arith.constant 0 : i32
    return %c0_i32, %c0_i32_0, %c0_i32_1 : i32, i32, i32
  }
  func.func @transform_2(%arg0: i32, %arg1: i32) -> (i32, i32) {
    %c0_i32 = arith.constant 0 : i32
    %c0_i32_0 = arith.constant 0 : i32
    %c0_i32_1 = arith.constant 0 : i32
    return %c0_i32, %c0_i32_0 : i32, i32
  }
  func.func @transform_3(%arg0: i32, %arg1: i32) -> (i32, i32, i32) {
    %c0_i32 = arith.constant 0 : i32
    %c0_i32_0 = arith.constant 0 : i32
    return %arg0, %arg1, %c0_i32 : i32, i32, i32
  }
}

</mosaic_0001>

<bundles_post_ra>
// kernel: tpu_custom_call.1
= control target key start
LH: loop header
LB: loop body
LE: loop exit
PB: predicated region body
PF: predicated region fallthrough
CT: control target
= control target key end

     0   :  { %s1887_s12 = smov 0   ;;  %s1889_s13 = smov 0   ;;  %s2073_s0 = inlined_call_operand.vmem [shape: f32[2,8,8,4], index: 0, kind: input, shape index: {}]   ;;  %s2074_s1 = inlined_call_operand.vmem [shape: f32[16,4,32], index: 1, kind: input, shape index: {}]   ;;  %s2075_s2 = inlined_call_operand.vmem [shape: f32[1,32], index: 2, kind: input, shape index: {}]   ;;  %s2076_s3 = inlined_call_operand.vmem [shape: f32[2,7,32], index: 3, kind: output, shape index: {}]  }
   0x1   :  { %s1891_s14 = smov 0  }
   0x2 LB: > { %s25_s15 = sadd.s32 1, %s1859_s13  ;;  %p1633_p0 = scmp.ge.s32.totalorder %s1863_s14, 1  ;;  %s1863_s14 = sphi %s1891_s14, %s13_s14   ;;  %s1859_s13 = sphi %s1889_s13, %s2078_s13   ;;  %s1855_s12 = sphi %s1887_s12, %s2077_s12  }
   0x3   : > { %p27_p1 = scmp.ge.s32.totalorder %s25_s15, 2  ;;  %p151_p2 = scmp.lt.s32.totalorder %s1863_s14, 3 }
   0x5   : > { %s2080_s15 = smov (%p27_p1, %s25_s15), 0  ;;  %p152_p3 = pnand %p1633_p0, %p151_p2 }
   0x6   : > { %p177_p4 = scmp.lt.s32.totalorder (!%p152_p3), %s1855_s12, 1 }
   0x7   : > { %155 = sbr.rel (%p152_p3) target bundleno = 247 (0xf7), region = 32 }
   0xc   : > { %v1638_v0 = vld [vmem:[%s2074_s1 + $0x4] sm:$0xf]  ;;  %vm202_vm0 = vcmask 1043456   ;;  %v1865_v1 = vmov 0.0   ;;  %v192_v2 = vld [vmem:[%s2074_s1] sm:$0xf] }
   0xd   : > { %1735 = vmatprep.subr.mxu0 %v1865_v1  ;;  %1740 = vmatprep.subr.mxu1 %v1865_v1  ;;  %vm1866_vm1 = vmmov 0   ;;  %s2082_s12 = smov (!%p177_p4, %s1855_s12), 1  ;;  %vm198_vm2 = vcmask 31744   ;;  %v1644_v3 = vld [vmem:[%s2074_s1 + $0x8] sm:$0xf]  ;;  %vm1509_vm3 = vcmask 260096  }
   0xe   : > { %1736 = vmatpush3.msk.msra.mxu0 %vm202_vm0, %v1638_v0  ;;  %1737 = vmatprep.mubr.msk.f32.mxu0 %vm1866_vm1, %v1865_v1  ;;  %s1702_s20 = sshll.u32 %s2082_s12, 6  ;;  %v1648_v4 = vld [vmem:[%s2074_s1 + $0xc] sm:$0xf]  ;;  %v1652_v9 = vld [vmem:[%s2074_s1 + $0x10] sm:$0xf]  ;;  %s1636_s4 = sshll.u32 %s2082_s12, 3 }
   0xf   : > { %1741 = vmatpush3.msk.msra.mxu1 %vm202_vm0, %v192_v2  ;;  %1742 = vmatprep.mubr.msk.f32.mxu1 %vm1866_vm1, %v1865_v1  ;;  %s1927_s23 = scalar_lea.vmem %s2073_s0, %s1702_s20  ;;  %v1656_v10 = vld [vmem:[%s2074_s1 + $0x14] sm:$0xf]  ;;  %v1660_v13 = vld [vmem:[%s2074_s1 + $0x18] sm:$0xf]  ;;  %v1664_v14 = vld [vmem:[%s2074_s1 + $0x1c] sm:$0xf]  ;;  %s188_s7 = scalar_lea.vmem %s2076_s3, %s1636_s4 }
  0x10   : > { %1745 = vmatprep.subr.mxu0 %v1865_v1  ;;  %1750 = vmatprep.subr.mxu1 %v1865_v1  ;;  %v1637_v5 = vld [vmem:[%s1927_s23 + $0x8] sm:$0x7f]  ;;  %v191_v6 = vld [vmem:[%s1927_s23] sm:$0x7f]  ;;  %v1643_v7 = vld [vmem:[%s1927_s23 + $0x10] sm:$0x7f] }
  0x11   : > { %1738 = vmatmul.mubr.msk.f32.vlgmr.msra.gmra.mxu0 %vm198_vm2, %v1637_v5  ;;  %1743 = vmatmul.mubr.msk.f32.vlgmr.msra.gmra.mxu1 %vm198_vm2, %v191_v6  ;;  %v1647_v8 = vld [vmem:[%s1927_s23 + $0x18] sm:$0x7f]  ;;  %v1651_v11 = vld [vmem:[%s1927_s23 + $0x20] sm:$0x7f]  ;;  %v1655_v12 = vld [vmem:[%s1927_s23 + $0x28] sm:$0x7f] }
  0x12   : > { %1746 = vmatpush3.msk.msra.mxu0 %vm202_vm0, %v1644_v3  ;;  %1751 = vmatpush3.msk.msra.mxu1 %vm202_vm0, %v1648_v4  ;;  %v1659_v15 = vld [vmem:[%s1927_s23 + $0x30] sm:$0x7f]  ;;  %v1663_v16 = vld [vmem:[%s1927_s23 + $0x38] sm:$0x7f]  ;;  %v1668_v17 = vld [vmem:[%s2074_s1 + $0x20] sm:$0xf] }
  0x13   : > { %1747 = vmatprep.mubr.msk.f32.mxu0 %vm1866_vm1, %v1865_v1  ;;  %1752 = vmatprep.mubr.msk.f32.mxu1 %vm1866_vm1, %v1865_v1  ;;  %v1672_v18 = vld [vmem:[%s2074_s1 + $0x24] sm:$0xf]  ;;  %v1671_v20 = vld [vmem:[%s1927_s23 + $0x9] sm:$0x7f]  ;;  %v1675_v23 = vld [vmem:[%s1927_s23 + $0x11] sm:$0x7f] }
  0x14   : > { %1755 = vmatprep.subr.mxu0 %v1865_v1  ;;  %1760 = vmatprep.subr.mxu1 %v1865_v1  ;;  %v1667_v19 = vld [vmem:[%s1927_s23 + $0x1] sm:$0x7f]  ;;  %v1676_v21 = vld [vmem:[%s2074_s1 + $0x28] sm:$0xf]  ;;  %v1680_v22 = vld [vmem:[%s2074_s1 + $0x2c] sm:$0xf] }
  0x15   : > { %1748 = vmatmul.mubr.msk.f32.vlgmr.msra.gmra.mxu0 %vm198_vm2, %v1643_v7  ;;  %1753 = vmatmul.mubr.msk.f32.vlgmr.msra.gmra.mxu1 %vm198_vm2, %v1647_v8  ;;  %v1679_v24 = vld [vmem:[%s1927_s23 + $0x19] sm:$0x7f]  ;;  %v1684_v25 = vld [vmem:[%s2074_s1 + $0x30] sm:$0xf]  ;;  %v1688_v26 = vld [vmem:[%s2074_s1 + $0x34] sm:$0xf] }
  0x16   : > { %1756 = vmatpush3.msk.msra.mxu0 %vm202_vm0, %v1652_v9  ;;  %1761 = vmatpush3.msk.msra.mxu1 %vm202_vm0, %v1656_v10  ;;  %v1683_v27 = vld [vmem:[%s1927_s23 + $0x21] sm:$0x7f]  ;;  %v1687_v28 = vld [vmem:[%s1927_s23 + $0x29] sm:$0x7f]  ;;  %v1692_v29 = vld [vmem:[%s2074_s1 + $0x38] sm:$0xf] }
  0x17   : > { %1757 = vmatprep.mubr.msk.f32.mxu0 %vm1866_vm1, %v1865_v1  ;;  %1762 = vmatprep.mubr.msk.f32.mxu1 %vm1866_vm1, %v1865_v1  ;;  %v1696_v30 = vld [vmem:[%s2074_s1 + $0x3c] sm:$0xf]  ;;  %v1691_v31 = vld [vmem:[%s1927_s23 + $0x31] sm:$0x7f] }
  0x18   : > { %1765 = vmatprep.subr.mxu0 %v1865_v1  ;;  %1770 = vmatprep.subr.mxu1 %v1865_v1  ;;  %v1695_v32 = vld [vmem:[%s1927_s23 + $0x39] sm:$0x7f] }
  0x19   : > { %1758 = vmatmul.mubr.msk.f32.vlgmr.msra.gmra.mxu0 %vm198_vm2, %v1651_v11  ;;  %1763 = vmatmul.mubr.msk.f32.vlgmr.msra.gmra.mxu1 %vm198_vm2, %v1655_v12 }
  0x1a   : > { %1766 = vmatpush3.msk.msra.mxu0 %vm202_vm0, %v1660_v13  ;;  %1771 = vmatpush3.msk.msra.mxu1 %vm202_vm0, %v1664_v14  ;;  %v1699_v13 = vld [vmem:[%s2075_s2] ss:$0 sm:$0xff] }
  0x1b   : > { %1767 = vmatprep.mubr.msk.f32.mxu0 %vm1866_vm1, %v1865_v1  ;;  %1772 = vmatprep.mubr.msk.f32.mxu1 %vm1866_vm1, %v1865_v1 }
  0x1c   : > { %1775 = vmatprep.subr.mxu0 %v1865_v1  ;;  %1780 = vmatprep.subr.mxu1 %v1865_v1 }
  0x1d   : > { %1768 = vmatmul.mubr.msk.f32.vlgmr.msra.gmra.mxu0 %vm198_vm2, %v1659_v15  ;;  %1773 = vmatmul.mubr.msk.f32.vlgmr.msra.gmra.mxu1 %vm198_vm2, %v1663_v16 }
  0x1e   : > { %1776 = vmatpush3.msk.msra.mxu0 %vm202_vm0, %v1668_v17  ;;  %1781 = vmatpush3.msk.msra.mxu1 %vm202_vm0, %v1672_v18 }
  0x1f   : > { %1777 = vmatprep.mubr.msk.f32.mxu0 %vm1866_vm1, %v1865_v1  ;;  %1782 = vmatprep.mubr.msk.f32.mxu1 %vm1866_vm1, %v1865_v1 }
  0x20   : > { %1785 = vmatprep.subr.mxu0 %v1865_v1  ;;  %1790 = vmatprep.subr.mxu1 %v1865_v1 }
  0x21   : > { %1778 = vmatmul.mubr.msk.f32.vlgmr.msra.gmra.mxu0 %vm198_vm2, %v1667_v19  ;;  %1783 = vmatmul.mubr.msk.f32.vlgmr.msra.gmra.mxu1 %vm198_vm2, %v1671_v20 }
  0x22   : > { %1786 = vmatpush3.msk.msra.mxu0 %vm202_vm0, %v1676_v21  ;;  %1791 = vmatpush3.msk.msra.mxu1 %vm202_vm0, %v1680_v22 }
  0x23   : > { %1787 = vmatprep.mubr.msk.f32.mxu0 %vm1866_vm1, %v1865_v1  ;;  %1792 = vmatprep.mubr.msk.f32.mxu1 %vm1866_vm1, %v1865_v1 }
  0x24   : > { %1795 = vmatprep.subr.mxu0 %v1865_v1  ;;  %1800 = vmatprep.subr.mxu1 %v1865_v1 }
  0x25   : > { %1788 = vmatmul.mubr.msk.f32.vlgmr.msra.gmra.mxu0 %vm198_vm2, %v1675_v23  ;;  %1793 = vmatmul.mubr.msk.f32.vlgmr.msra.gmra.mxu1 %vm198_vm2, %v1679_v24 }
  0x26   : > { %1796 = vmatpush3.msk.msra.mxu0 %vm202_vm0, %v1684_v25  ;;  %1801 = vmatpush3.msk.msra.mxu1 %vm202_vm0, %v1688_v26 }
  0x27   : > { %1797 = vmatprep.mubr.msk.f32.mxu0 %vm1866_vm1, %v1865_v1  ;;  %1802 = vmatprep.mubr.msk.f32.mxu1 %vm1866_vm1, %v1865_v1 }
  0x28   : > { %1805 = vmatprep.subr.mxu0 %v1865_v1  ;;  %1810 = vmatprep.subr.mxu1 %v1865_v1 }
  0x29   : > { %1798 = vmatmul.mubr.msk.f32.vlgmr.msra.gmra.mxu0 %vm198_vm2, %v1683_v27  ;;  %1803 = vmatmul.mubr.msk.f32.vlgmr.msra.gmra.mxu1 %vm198_vm2, %v1687_v28 }
  0x2a   : > { %1806 = vmatpush3.msk.msra.mxu0 %vm202_vm0, %v1692_v29  ;;  %1811 = vmatpush3.msk.msra.mxu1 %vm202_vm0, %v1696_v30 }
  0x2b   : > { %1807 = vmatprep.mubr.msk.f32.mxu0 %vm1866_vm1, %v1865_v1  ;;  %1812 = vmatprep.mubr.msk.f32.mxu1 %vm1866_vm1, %v1865_v1 }
  0x2d   : > { %1808 = vmatmul.mubr.msk.f32.vlgmr.msra.gmra.mxu0 %vm198_vm2, %v1691_v31  ;;  %1813 = vmatmul.mubr.msk.f32.vlgmr.msra.gmra.mxu1 %vm198_vm2, %v1695_v32 }
  0xd1   : > { %v272_v33 = vpop.f32.mrf.mxu0  ;;  %v348_v34 = vpop.f32.mrf.mxu1 }
  0xd2   : > { %v349_v37 = vadd.f32 %v348_v34, %v272_v33 }
  0xd3   : > { %v1739_v35 = vpop.f32.mrf.mxu0  ;;  %v1744_v36 = vpop.f32.mrf.mxu1 }
  0xd5   : > { %v429_v38 = vpop.f32.mrf.mxu0  ;;  %v511_v39 = vpop.f32.mrf.mxu1 }
  0xd6   : > { %v433_v40 = vadd.f32 %v429_v38, %v349_v37 }
  0xd7   : > { %v1749_v41 = vpop.f32.mrf.mxu0  ;;  %v1754_v42 = vpop.f32.mrf.mxu1 }
  0xd8   : > { %v515_v43 = vadd.f32 %v511_v39, %v433_v40 }
  0xd9   : > { %v593_v44 = vpop.f32.mrf.mxu0  ;;  %v675_v45 = vpop.f32.mrf.mxu1 }
  0xda   : > { %v597_v46 = vadd.f32 %v593_v44, %v515_v43 }
  0xdb   : > { %v1759_v47 = vpop.f32.mrf.mxu0  ;;  %v1764_v48 = vpop.f32.mrf.mxu1 }
  0xdc   : > { %v679_v49 = vadd.f32 %v675_v45, %v597_v46 }
  0xdd   : > { %v757_v50 = vpop.f32.mrf.mxu0  ;;  %v839_v51 = vpop.f32.mrf.mxu1 }
  0xde   : > { %v761_v52 = vadd.f32 %v757_v50, %v679_v49 }
  0xdf   : > { %v1769_v53 = vpop.f32.mrf.mxu0  ;;  %v1774_v54 = vpop.f32.mrf.mxu1 }
  0xe0   : > { %v843_v55 = vadd.f32 %v839_v51, %v761_v52 }
  0xe1   : > { %v921_v56 = vpop.f32.mrf.mxu0  ;;  %v1003_v57 = vpop.f32.mrf.mxu1 }
  0xe2   : > { %v925_v58 = vadd.f32 %v921_v56, %v843_v55 }
  0xe3   : > { %v1779_v59 = vpop.f32.mrf.mxu0  ;;  %v1784_v60 = vpop.f32.mrf.mxu1 }
  0xe4   : > { %v1007_v61 = vadd.f32 %v1003_v57, %v925_v58 }
  0xe5   : > { %v1085_v62 = vpop.f32.mrf.mxu0  ;;  %v1167_v63 = vpop.f32.mrf.mxu1 }
  0xe6   : > { %v1089_v0 = vadd.f32 %v1085_v62, %v1007_v61 }
  0xe7   : > { %v1789_v1 = vpop.f32.mrf.mxu0  ;;  %v1794_v2 = vpop.f32.mrf.mxu1 }
  0xe8   : > { %v1171_v3 = vadd.f32 %v1167_v63, %v1089_v0 }
  0xe9   : > { %v1249_v4 = vpop.f32.mrf.mxu0  ;;  %v1331_v5 = vpop.f32.mrf.mxu1 }
  0xea   : > { %v1253_v6 = vadd.f32 %v1249_v4, %v1171_v3 }
  0xeb   : > { %v1799_v7 = vpop.f32.mrf.mxu0  ;;  %v1804_v8 = vpop.f32.mrf.mxu1 }
  0xec   : > { %v1335_v9 = vadd.f32 %v1331_v5, %v1253_v6 }
  0xed   : > { %v1413_v10 = vpop.f32.mrf.mxu0  ;;  %v1495_v11 = vpop.f32.mrf.mxu1 }
  0xee   : > { %v1417_v12 = vadd.f32 %v1413_v10, %v1335_v9 }
  0xef   : > { %v1809_v14 = vpop.f32.mrf.mxu0  ;;  %v1814_v15 = vpop.f32.mrf.mxu1 }
  0xf0   : > { %v1499_v16 = vadd.f32 %v1495_v11, %v1417_v12 }
  0xf2   : > { %v1507_v17 = vadd.f32 %v1699_v13, %v1499_v16 }
  0xf4   : > { %v1508_v18 = vmax.f32 %v1507_v17, 0.0 }
  0xf6   : > { %1510 = vst.msk [vmem:[%s188_s7] sm:$0x7f] %vm1509_vm3, %v1508_v18 }
  0xf7 PF: > { %s13_s14 = sadd.s32 1, %s1863_s14   ;;  %s2077_s12 = smov %s1859_s13 }
  0xf8   : > { %p10_p5 = scmp.ge.s32.totalorder %s13_s14, 4   ;;  %s2078_s13 = smov %s2080_s15 }
  0xfa   :  { %12 = sbr.rel (!%p10_p5) target bundleno = 2 (0x2), region = 93 }

// kernel: tpu_custom_call.1
= control target key start
LH: loop header
LB: loop body
LE: loop exit
PB: predicated region body
PF: predicated region fallthrough
CT: control target
= control target key end

     0   :  { %s1887_s12 = smov 0   ;;  %s1889_s13 = smov 0   ;;  %s2073_s0 = inlined_call_operand.vmem [shape: f32[2,8,8,4], index: 0, kind: input, shape index: {}]   ;;  %s2074_s1 = inlined_call_operand.vmem [shape: f32[16,4,32], index: 1, kind: input, shape index: {}]   ;;  %s2075_s2 = inlined_call_operand.vmem [shape: f32[1,32], index: 2, kind: input, shape index: {}]   ;;  %s2076_s3 = inlined_call_operand.vmem [shape: f32[2,7,32], index: 3, kind: output, shape index: {}]  }
   0x1   :  { %s1891_s14 = smov 0  }
   0x2 LB: > { %s25_s15 = sadd.s32 1, %s1859_s13  ;;  %p1633_p0 = scmp.ge.s32.totalorder %s1863_s14, 1  ;;  %s1863_s14 = sphi %s1891_s14, %s13_s14   ;;  %s1859_s13 = sphi %s1889_s13, %s2078_s13   ;;  %s1855_s12 = sphi %s1887_s12, %s2077_s12  }
   0x3   : > { %p27_p1 = scmp.ge.s32.totalorder %s25_s15, 2  ;;  %p151_p2 = scmp.lt.s32.totalorder %s1863_s14, 3 }
   0x5   : > { %s2080_s15 = smov (%p27_p1, %s25_s15), 0  ;;  %p152_p3 = pnand %p1633_p0, %p151_p2 }
   0x6   : > { %p177_p4 = scmp.lt.s32.totalorder (!%p152_p3), %s1855_s12, 1 }
   0x7   : > { %155 = sbr.rel (%p152_p3) target bundleno = 247 (0xf7), region = 32 }
   0xc   : > { %v1638_v0 = vld [vmem:[%s2074_s1 + $0x4] sm:$0xf]  ;;  %vm202_vm0 = vcmask 1043456   ;;  %v1865_v1 = vmov 0.0   ;;  %v192_v2 = vld [vmem:[%s2074_s1] sm:$0xf] }
   0xd   : > { %1735 = vmatprep.subr.mxu0 %v1865_v1  ;;  %1740 = vmatprep.subr.mxu1 %v1865_v1  ;;  %vm1866_vm1 = vmmov 0   ;;  %s2082_s12 = smov (!%p177_p4, %s1855_s12), 1  ;;  %vm198_vm2 = vcmask 31744   ;;  %v1644_v3 = vld [vmem:[%s2074_s1 + $0x8] sm:$0xf]  ;;  %vm1509_vm3 = vcmask 260096  }
   0xe   : > { %1736 = vmatpush3.msk.msra.mxu0 %vm202_vm0, %v1638_v0  ;;  %1737 = vmatprep.mubr.msk.f32.mxu0 %vm1866_vm1, %v1865_v1  ;;  %s1702_s20 = sshll.u32 %s2082_s12, 6  ;;  %v1648_v4 = vld [vmem:[%s2074_s1 + $0xc] sm:$0xf]  ;;  %v1652_v9 = vld [vmem:[%s2074_s1 + $0x10] sm:$0xf]  ;;  %s1636_s4 = sshll.u32 %s2082_s12, 3 }
   0xf   : > { %1741 = vmatpush3.msk.msra.mxu1 %vm202_vm0, %v192_v2  ;;  %1742 = vmatprep.mubr.msk.f32.mxu1 %vm1866_vm1, %v1865_v1  ;;  %s1927_s23 = scalar_lea.vmem %s2073_s0, %s1702_s20  ;;  %v1656_v10 = vld [vmem:[%s2074_s1 + $0x14] sm:$0xf]  ;;  %v1660_v13 = vld [vmem:[%s2074_s1 + $0x18] sm:$0xf]  ;;  %v1664_v14 = vld [vmem:[%s2074_s1 + $0x1c] sm:$0xf]  ;;  %s188_s7 = scalar_lea.vmem %s2076_s3, %s1636_s4 }
  0x10   : > { %1745 = vmatprep.subr.mxu0 %v1865_v1  ;;  %1750 = vmatprep.subr.mxu1 %v1865_v1  ;;  %v1637_v5 = vld [vmem:[%s1927_s23 + $0x8] sm:$0x7f]  ;;  %v191_v6 = vld [vmem:[%s1927_s23] sm:$0x7f]  ;;  %v1643_v7 = vld [vmem:[%s1927_s23 + $0x10] sm:$0x7f] }
  0x11   : > { %1738 = vmatmul.mubr.msk.f32.vlgmr.msra.gmra.mxu0 %vm198_vm2, %v1637_v5  ;;  %1743 = vmatmul.mubr.msk.f32.vlgmr.msra.gmra.mxu1 %vm198_vm2, %v191_v6  ;;  %v1647_v8 = vld [vmem:[%s1927_s23 + $0x18] sm:$0x7f]  ;;  %v1651_v11 = vld [vmem:[%s1927_s23 + $0x20] sm:$0x7f]  ;;  %v1655_v12 = vld [vmem:[%s1927_s23 + $0x28] sm:$0x7f] }
  0x12   : > { %1746 = vmatpush3.msk.msra.mxu0 %vm202_vm0, %v1644_v3  ;;  %1751 = vmatpush3.msk.msra.mxu1 %vm202_vm0, %v1648_v4  ;;  %v1659_v15 = vld [vmem:[%s1927_s23 + $0x30] sm:$0x7f]  ;;  %v1663_v16 = vld [vmem:[%s1927_s23 + $0x38] sm:$0x7f]  ;;  %v1668_v17 = vld [vmem:[%s2074_s1 + $0x20] sm:$0xf] }
  0x13   : > { %1747 = vmatprep.mubr.msk.f32.mxu0 %vm1866_vm1, %v1865_v1  ;;  %1752 = vmatprep.mubr.msk.f32.mxu1 %vm1866_vm1, %v1865_v1  ;;  %v1672_v18 = vld [vmem:[%s2074_s1 + $0x24] sm:$0xf]  ;;  %v1671_v20 = vld [vmem:[%s1927_s23 + $0x9] sm:$0x7f]  ;;  %v1675_v23 = vld [vmem:[%s1927_s23 + $0x11] sm:$0x7f] }
  0x14   : > { %1755 = vmatprep.subr.mxu0 %v1865_v1  ;;  %1760 = vmatprep.subr.mxu1 %v1865_v1  ;;  %v1667_v19 = vld [vmem:[%s1927_s23 + $0x1] sm:$0x7f]  ;;  %v1676_v21 = vld [vmem:[%s2074_s1 + $0x28] sm:$0xf]  ;;  %v1680_v22 = vld [vmem:[%s2074_s1 + $0x2c] sm:$0xf] }
  0x15   : > { %1748 = vmatmul.mubr.msk.f32.vlgmr.msra.gmra.mxu0 %vm198_vm2, %v1643_v7  ;;  %1753 = vmatmul.mubr.msk.f32.vlgmr.msra.gmra.mxu1 %vm198_vm2, %v1647_v8  ;;  %v1679_v24 = vld [vmem:[%s1927_s23 + $0x19] sm:$0x7f]  ;;  %v1684_v25 = vld [vmem:[%s2074_s1 + $0x30] sm:$0xf]  ;;  %v1688_v26 = vld [vmem:[%s2074_s1 + $0x34] sm:$0xf] }
  0x16   : > { %1756 = vmatpush3.msk.msra.mxu0 %vm202_vm0, %v1652_v9  ;;  %1761 = vmatpush3.msk.msra.mxu1 %vm202_vm0, %v1656_v10  ;;  %v1683_v27 = vld [vmem:[%s1927_s23 + $0x21] sm:$0x7f]  ;;  %v1687_v28 = vld [vmem:[%s1927_s23 + $0x29] sm:$0x7f]  ;;  %v1692_v29 = vld [vmem:[%s2074_s1 + $0x38] sm:$0xf] }
  0x17   : > { %1757 = vmatprep.mubr.msk.f32.mxu0 %vm1866_vm1, %v1865_v1  ;;  %1762 = vmatprep.mubr.msk.f32.mxu1 %vm1866_vm1, %v1865_v1  ;;  %v1696_v30 = vld [vmem:[%s2074_s1 + $0x3c] sm:$0xf]  ;;  %v1691_v31 = vld [vmem:[%s1927_s23 + $0x31] sm:$0x7f] }
  0x18   : > { %1765 = vmatprep.subr.mxu0 %v1865_v1  ;;  %1770 = vmatprep.subr.mxu1 %v1865_v1  ;;  %v1695_v32 = vld [vmem:[%s1927_s23 + $0x39] sm:$0x7f] }
  0x19   : > { %1758 = vmatmul.mubr.msk.f32.vlgmr.msra.gmra.mxu0 %vm198_vm2, %v1651_v11  ;;  %1763 = vmatmul.mubr.msk.f32.vlgmr.msra.gmra.mxu1 %vm198_vm2, %v1655_v12 }
  0x1a   : > { %1766 = vmatpush3.msk.msra.mxu0 %vm202_vm0, %v1660_v13  ;;  %1771 = vmatpush3.msk.msra.mxu1 %vm202_vm0, %v1664_v14  ;;  %v1699_v13 = vld [vmem:[%s2075_s2] ss:$0 sm:$0xff] }
  0x1b   : > { %1767 = vmatprep.mubr.msk.f32.mxu0 %vm1866_vm1, %v1865_v1  ;;  %1772 = vmatprep.mubr.msk.f32.mxu1 %vm1866_vm1, %v1865_v1 }
  0x1c   : > { %1775 = vmatprep.subr.mxu0 %v1865_v1  ;;  %1780 = vmatprep.subr.mxu1 %v1865_v1 }
  0x1d   : > { %1768 = vmatmul.mubr.msk.f32.vlgmr.msra.gmra.mxu0 %vm198_vm2, %v1659_v15  ;;  %1773 = vmatmul.mubr.msk.f32.vlgmr.msra.gmra.mxu1 %vm198_vm2, %v1663_v16 }
  0x1e   : > { %1776 = vmatpush3.msk.msra.mxu0 %vm202_vm0, %v1668_v17  ;;  %1781 = vmatpush3.msk.msra.mxu1 %vm202_vm0, %v1672_v18 }
  0x1f   : > { %1777 = vmatprep.mubr.msk.f32.mxu0 %vm1866_vm1, %v1865_v1  ;;  %1782 = vmatprep.mubr.msk.f32.mxu1 %vm1866_vm1, %v1865_v1 }
  0x20   : > { %1785 = vmatprep.subr.mxu0 %v1865_v1  ;;  %1790 = vmatprep.subr.mxu1 %v1865_v1 }
  0x21   : > { %1778 = vmatmul.mubr.msk.f32.vlgmr.msra.gmra.mxu0 %vm198_vm2, %v1667_v19  ;;  %1783 = vmatmul.mubr.msk.f32.vlgmr.msra.gmra.mxu1 %vm198_vm2, %v1671_v20 }
  0x22   : > { %1786 = vmatpush3.msk.msra.mxu0 %vm202_vm0, %v1676_v21  ;;  %1791 = vmatpush3.msk.msra.mxu1 %vm202_vm0, %v1680_v22 }
  0x23   : > { %1787 = vmatprep.mubr.msk.f32.mxu0 %vm1866_vm1, %v1865_v1  ;;  %1792 = vmatprep.mubr.msk.f32.mxu1 %vm1866_vm1, %v1865_v1 }
  0x24   : > { %1795 = vmatprep.subr.mxu0 %v1865_v1  ;;  %1800 = vmatprep.subr.mxu1 %v1865_v1 }
  0x25   : > { %1788 = vmatmul.mubr.msk.f32.vlgmr.msra.gmra.mxu0 %vm198_vm2, %v1675_v23  ;;  %1793 = vmatmul.mubr.msk.f32.vlgmr.msra.gmra.mxu1 %vm198_vm2, %v1679_v24 }
  0x26   : > { %1796 = vmatpush3.msk.msra.mxu0 %vm202_vm0, %v1684_v25  ;;  %1801 = vmatpush3.msk.msra.mxu1 %vm202_vm0, %v1688_v26 }
  0x27   : > { %1797 = vmatprep.mubr.msk.f32.mxu0 %vm1866_vm1, %v1865_v1  ;;  %1802 = vmatprep.mubr.msk.f32.mxu1 %vm1866_vm1, %v1865_v1 }
  0x28   : > { %1805 = vmatprep.subr.mxu0 %v1865_v1  ;;  %1810 = vmatprep.subr.mxu1 %v1865_v1 }
  0x29   : > { %1798 = vmatmul.mubr.msk.f32.vlgmr.msra.gmra.mxu0 %vm198_vm2, %v1683_v27  ;;  %1803 = vmatmul.mubr.msk.f32.vlgmr.msra.gmra.mxu1 %vm198_vm2, %v1687_v28 }
  0x2a   : > { %1806 = vmatpush3.msk.msra.mxu0 %vm202_vm0, %v1692_v29  ;;  %1811 = vmatpush3.msk.msra.mxu1 %vm202_vm0, %v1696_v30 }
  0x2b   : > { %1807 = vmatprep.mubr.msk.f32.mxu0 %vm1866_vm1, %v1865_v1  ;;  %1812 = vmatprep.mubr.msk.f32.mxu1 %vm1866_vm1, %v1865_v1 }
  0x2d   : > { %1808 = vmatmul.mubr.msk.f32.vlgmr.msra.gmra.mxu0 %vm198_vm2, %v1691_v31  ;;  %1813 = vmatmul.mubr.msk.f32.vlgmr.msra.gmra.mxu1 %vm198_vm2, %v1695_v32 }
  0xd1   : > { %v272_v33 = vpop.f32.mrf.mxu0  ;;  %v348_v34 = vpop.f32.mrf.mxu1 }
  0xd2   : > { %v349_v37 = vadd.f32 %v348_v34, %v272_v33 }
  0xd3   : > { %v1739_v35 = vpop.f32.mrf.mxu0  ;;  %v1744_v36 = vpop.f32.mrf.mxu1 }
  0xd5   : > { %v429_v38 = vpop.f32.mrf.mxu0  ;;  %v511_v39 = vpop.f32.mrf.mxu1 }
  0xd6   : > { %v433_v40 = vadd.f32 %v429_v38, %v349_v37 }
  0xd7   : > { %v1749_v41 = vpop.f32.mrf.mxu0  ;;  %v1754_v42 = vpop.f32.mrf.mxu1 }
  0xd8   : > { %v515_v43 = vadd.f32 %v511_v39, %v433_v40 }
  0xd9   : > { %v593_v44 = vpop.f32.mrf.mxu0  ;;  %v675_v45 = vpop.f32.mrf.mxu1 }
  0xda   : > { %v597_v46 = vadd.f32 %v593_v44, %v515_v43 }
  0xdb   : > { %v1759_v47 = vpop.f32.mrf.mxu0  ;;  %v1764_v48 = vpop.f32.mrf.mxu1 }
  0xdc   : > { %v679_v49 = vadd.f32 %v675_v45, %v597_v46 }
  0xdd   : > { %v757_v50 = vpop.f32.mrf.mxu0  ;;  %v839_v51 = vpop.f32.mrf.mxu1 }
  0xde   : > { %v761_v52 = vadd.f32 %v757_v50, %v679_v49 }
  0xdf   : > { %v1769_v53 = vpop.f32.mrf.mxu0  ;;  %v1774_v54 = vpop.f32.mrf.mxu1 }
  0xe0   : > { %v843_v55 = vadd.f32 %v839_v51, %v761_v52 }
  0xe1   : > { %v921_v56 = vpop.f32.mrf.mxu0  ;;  %v1003_v57 = vpop.f32.mrf.mxu1 }
  0xe2   : > { %v925_v58 = vadd.f32 %v921_v56, %v843_v55 }
  0xe3   : > { %v1779_v59 = vpop.f32.mrf.mxu0  ;;  %v1784_v60 = vpop.f32.mrf.mxu1 }
  0xe4   : > { %v1007_v61 = vadd.f32 %v1003_v57, %v925_v58 }
  0xe5   : > { %v1085_v62 = vpop.f32.mrf.mxu0  ;;  %v1167_v63 = vpop.f32.mrf.mxu1 }
  0xe6   : > { %v1089_v0 = vadd.f32 %v1085_v62, %v1007_v61 }
  0xe7   : > { %v1789_v1 = vpop.f32.mrf.mxu0  ;;  %v1794_v2 = vpop.f32.mrf.mxu1 }
  0xe8   : > { %v1171_v3 = vadd.f32 %v1167_v63, %v1089_v0 }
  0xe9   : > { %v1249_v4 = vpop.f32.mrf.mxu0  ;;  %v1331_v5 = vpop.f32.mrf.mxu1 }
  0xea   : > { %v1253_v6 = vadd.f32 %v1249_v4, %v1171_v3 }
  0xeb   : > { %v1799_v7 = vpop.f32.mrf.mxu0  ;;  %v1804_v8 = vpop.f32.mrf.mxu1 }
  0xec   : > { %v1335_v9 = vadd.f32 %v1331_v5, %v1253_v6 }
  0xed   : > { %v1413_v10 = vpop.f32.mrf.mxu0  ;;  %v1495_v11 = vpop.f32.mrf.mxu1 }
  0xee   : > { %v1417_v12 = vadd.f32 %v1413_v10, %v1335_v9 }
  0xef   : > { %v1809_v14 = vpop.f32.mrf.mxu0  ;;  %v1814_v15 = vpop.f32.mrf.mxu1 }
  0xf0   : > { %v1499_v16 = vadd.f32 %v1495_v11, %v1417_v12 }
  0xf2   : > { %v1507_v17 = vadd.f32 %v1699_v13, %v1499_v16 }
  0xf4   : > { %v1508_v18 = vmax.f32 %v1507_v17, 0.0 }
  0xf6   : > { %1510 = vst.msk [vmem:[%s188_s7] sm:$0x7f] %vm1509_vm3, %v1508_v18 }
  0xf7 PF: > { %s13_s14 = sadd.s32 1, %s1863_s14   ;;  %s2077_s12 = smov %s1859_s13 }
  0xf8   : > { %p10_p5 = scmp.ge.s32.totalorder %s13_s14, 4   ;;  %s2078_s13 = smov %s2080_s15 }
  0xfa   :  { %12 = sbr.rel (!%p10_p5) target bundleno = 2 (0x2), region = 93 }

</bundles_post_ra>
